<compile_context>
chip_gen: v7x
topology: tpu7x:2x2x1
jax: 0.10.0
libtpu: 0.0.40
codegen_flags: <defaults>
</compile_context>

<pallas_src>
import jax
import jax.numpy as jnp
from jax.experimental import pallas as pl
from jax.experimental.pallas import tpu as pltpu

K = 5  # conv kernel size (fixed by the module)


def char_conv_max_kernel(ids_ref, tab_ref, b_ref, o_ref):
    """ids_ref: (tn, W + K - 1) int32  width-padded char ids (sentinel < 0 at pads)
       tab_ref: (K * NCp, Cc) f32      fused char-embedding x conv-weight table
       b_ref:   (1, Cc) f32            conv bias
       o_ref:   (tn, Cc) f32           max-over-width conv features
    """
    tn, wp = ids_ref.shape
    kncp, cc = tab_ref.shape
    ncp = kncp // K
    w = wp - (K - 1)

    # Disjoint-lane one-hot over (tap, char id): lane L = k*NCp + n is hot iff
    # the char at width position (t + k) of this word has id n.  Sentinel ids
    # are negative, never match any lane, and thus reproduce the conv's 'same'
    # zero padding (and make padded rows produce zero features).
    lane = jax.lax.broadcasted_iota(jnp.int32, (1, 1, kncp), 2)
    hit = None
    for k in range(K):  # static unroll over the 5 taps (tiny int32 lane slices)
        tgt = (ids_ref[:, k:k + w] + k * ncp)[:, :, None]   # (tn, w, 1)
        hk = lane == tgt                                    # (tn, w, kncp)
        hit = hk if hit is None else hit | hk

    x = hit.astype(jnp.float32).reshape(tn * w, kncp)
    # One MXU matmul does the char-embedding gather and all K conv taps at once.
    conv = jnp.dot(x, tab_ref[...], preferred_element_type=jnp.float32)
    pooled = jnp.max(conv.reshape(tn, w, cc), axis=1)       # max over width
    o_ref[...] = pooled + b_ref[...]                        # bias after the max


def char_conv_max(ids_pad, tab, conv_b, *, tn):
    """ids_pad: (Np, W+K-1) int32 (Np multiple of tn), tab: (K*NCp, Cc) f32,
       conv_b: (1, Cc) f32  ->  (Np, Cc) f32."""
    n, wp = ids_pad.shape
    kncp, cc = tab.shape
    assert n % tn == 0 and tn % 8 == 0
    return pl.pallas_call(
        char_conv_max_kernel,
        out_shape=jax.ShapeDtypeStruct((n, cc), jnp.float32),
        grid_spec=pltpu.PrefetchScalarGridSpec(
            num_scalar_prefetch=0,
            grid=(n // tn,),
            in_specs=[
                pl.BlockSpec((tn, wp), lambda i: (i, 0)),       # ids tile
                pl.BlockSpec((kncp, cc), lambda i: (0, 0)),     # fused table (resident)
                pl.BlockSpec((1, cc), lambda i: (0, 0)),        # bias
            ],
            out_specs=pl.BlockSpec((tn, cc), lambda i: (i, 0)),
        ),
        compiler_params=pltpu.CompilerParams(
            dimension_semantics=("parallel",)),
    )(ids_pad, tab, conv_b)


def word_with_char_embedding_fwd(params, b_word_ids, b_char_ids, *, tn=None):
    """Matches WordWithCharEmbedding.forward in eval mode (dropout = identity)."""
    word_w, char_w = params["word_emb"], params["char_emb"]
    conv_w, conv_b = params["conv_w"], params["conv_b"]
    assert conv_w.shape[0] == K
    bsz, seq = b_word_ids.shape
    n = bsz * seq
    width = b_char_ids.shape[-1]
    nc = char_w.shape[0]
    cc = conv_w.shape[2]

    # word embedding lookup (plain XLA gather; padding_idx=0 row is zero)
    word_embedding = word_w[b_word_ids]                       # (B, S, Dw)

    # fused (char embedding x conv weight) lookup table: T[k*NCp + n, c]
    ncp = ((nc + 7) // 8) * 8
    tab = jnp.einsum("nd,kdc->knc", char_w, conv_w,
                     precision=jax.lax.Precision.HIGHEST)     # (K, NC, Cc)
    tab = jnp.pad(tab, ((0, 0), (0, ncp - nc), (0, 0))).reshape(K * ncp, cc)

    # width-pad ids with a sentinel that can never match a one-hot lane; this
    # reproduces the conv's 'same' zero padding without any f32 pad pass.
    sent = -(K * ncp + 1)
    ids = b_char_ids.reshape(n, width).astype(jnp.int32)
    ids = jnp.pad(ids, ((0, 0), (K // 2, K // 2)), constant_values=sent)

    # Row tile: large tiles for large N, but keep >= 2 grid steps when possible
    # (feeds both v7x TensorCores); leftover rows are padded with sentinels.
    if tn is None:
        tn = 128 if n >= 256 else max(8, ((n + 15) // 16) * 8)
    assert tn % 8 == 0
    n_pad = ((n + tn - 1) // tn) * tn
    ids = jnp.pad(ids, ((0, n_pad - n), (0, 0)), constant_values=sent)

    char_feat = char_conv_max(ids, tab, conv_b, tn=tn)[:n]    # (N, Cc)
    char_feat = char_feat.reshape(bsz, seq, cc)

    # dropout(0.5) is identity in eval mode.
    # TODO(synk): training-mode dropout (pltpu.prng_*) not implemented.
    return jnp.concatenate([word_embedding, char_feat], axis=2)


def make_params(key, num_words, num_chars, word_dim, char_dim, conv_dim):
    k1, k2, k3, k4 = jax.random.split(key, 4)
    # nn.Embedding default: N(0,1); padding_idx=0 -> zero row
    word_emb = jax.random.normal(k1, (num_words, word_dim), jnp.float32)
    word_emb = word_emb.at[0].set(0.0)
    # custom char init: U(-sqrt(3/Dc), sqrt(3/Dc)); padding_idx=0 -> zero row
    cb = float(jnp.sqrt(3.0 / char_dim))
    char_emb = jax.random.uniform(k2, (num_chars, char_dim), jnp.float32, -cb, cb)
    char_emb = char_emb.at[0].set(0.0)
    # Conv1d default init (kaiming-uniform-ish bound); layout (K, Dc, Cc)
    bound = 1.0 / float(jnp.sqrt(char_dim * K))
    conv_w = jax.random.uniform(k3, (K, char_dim, conv_dim), jnp.float32, -bound, bound)
    conv_b = jax.random.uniform(k4, (1, conv_dim), jnp.float32, -bound, bound)
    return {"word_emb": word_emb, "char_emb": char_emb,
            "conv_w": conv_w, "conv_b": conv_b}


def reference_fwd(params, b_word_ids, b_char_ids):
    """Plain-JAX f32 reference for the same forward pass (for self-check)."""
    hp = jax.lax.Precision.HIGHEST
    bsz, seq = b_word_ids.shape
    word_embedding = params["word_emb"][b_word_ids]
    flat_char_ids = b_char_ids.reshape(bsz * seq, -1)
    char_emb = params["char_emb"][flat_char_ids]                    # (N, W, Dc)
    char_emb_padded = jnp.pad(char_emb, ((0, 0), (K // 2, K // 2), (0, 0)))
    n, wp, _ = char_emb_padded.shape
    w = wp - K + 1
    cc = params["conv_w"].shape[2]
    acc = jnp.zeros((n, w, cc), jnp.float32)
    for k in range(K):
        acc = acc + jnp.einsum("nwd,dc->nwc",
                               char_emb_padded[:, k:k + w, :],
                               params["conv_w"][k], precision=hp)
    acc = acc + params["conv_b"][None, :, :]
    char_feat = jnp.max(acc, axis=1).reshape(bsz, seq, -1)
    return jnp.concatenate([word_embedding, char_feat], axis=2)


if __name__ == "__main__":
    # small synthetic config
    num_words, num_chars = 50, 30
    word_dim, char_dim, conv_dim = 32, 16, 32
    B, S, W = 2, 12, 16     # batch, seq_len, max word length (chars)

    key = jax.random.PRNGKey(0)
    kp, kw, kc = jax.random.split(key, 3)
    params = make_params(kp, num_words, num_chars, word_dim, char_dim, conv_dim)

    b_word_ids = jax.random.randint(kw, (B, S), 0, num_words, dtype=jnp.int32)
    b_char_ids = jax.random.randint(kc, (B, S, W), 0, num_chars, dtype=jnp.int32)

    ref = jax.block_until_ready(reference_fwd(params, b_word_ids, b_char_ids))

    # tn=None: auto tile (pads N=24 -> 32, 2-step grid); tn=8: exact split, 3 steps.
    for tn in (None, 8):
        out = jax.block_until_ready(
            word_with_char_embedding_fwd(params, b_word_ids, b_char_ids, tn=tn))
        assert out.shape == (B, S, word_dim + conv_dim), out.shape
        err = float(jnp.max(jnp.abs(out - ref)))
        assert jnp.allclose(out, ref, atol=1e-4, rtol=1e-4), err

    print("KERNEL_OK")
</pallas_src>

<mosaic_0001>
module attributes {stable_mosaic.version = 11 : i64} {
  func.func @char_conv_max_kernel(%arg0: i32, %arg1: memref<16x20xi32, #tpu.memory_space<vmem>>, %arg2: memref<160x32xf32, #tpu.memory_space<vmem>>, %arg3: memref<1x32xf32, #tpu.memory_space<vmem>>, %arg4: memref<16x32xf32, #tpu.memory_space<vmem>>) attributes {dimension_semantics = [#tpu.dimension_semantics<parallel>], iteration_bounds = array<i64: 2>, scalar_prefetch = 0 : i64, scratch_operands = 0 : i64, tpu.core_type = #tpu.core_type<tc>, window_params = [{transform_indices = @transform_0, window_bounds = array<i64: 16, 20>}, {pipeline_mode = #tpu.pipeline_mode<synchronous>, transform_indices = @transform_1, window_bounds = array<i64: 160, 32>}, {pipeline_mode = #tpu.pipeline_mode<synchronous>, transform_indices = @transform_2, window_bounds = array<i64: 1, 32>}, {transform_indices = @transform_3, window_bounds = array<i64: 16, 32>}]} {
    %0 = tpu.iota {dimensions = array<i32: 2>} : vector<1x1x160xi32>
    %c0 = arith.constant 0 : index
    %c0_0 = arith.constant 0 : index
    %1 = vector.load %arg1[%c0, %c0_0] : memref<16x20xi32, #tpu.memory_space<vmem>>, vector<16x16xi32>
    %c0_i32 = arith.constant 0 : i32
    %2 = vector.broadcast %c0_i32 : i32 to vector<16x16xi32>
    %3 = arith.addi %1, %2 : vector<16x16xi32>
    %4 = vector.shape_cast %3 : vector<16x16xi32> to vector<16x16x1xi32>
    %5 = vector.broadcast %0 : vector<1x1x160xi32> to vector<16x16x160xi32>
    %6 = vector.broadcast %4 : vector<16x16x1xi32> to vector<16x16x160xi32>
    %7 = arith.cmpi eq, %5, %6 : vector<16x16x160xi32>
    %c0_1 = arith.constant 0 : index
    %c1 = arith.constant 1 : index
    %8 = vector.load %arg1[%c0_1, %c1] : memref<16x20xi32, #tpu.memory_space<vmem>>, vector<16x16xi32>
    %c32_i32 = arith.constant 32 : i32
    %9 = vector.broadcast %c32_i32 : i32 to vector<16x16xi32>
    %10 = arith.addi %8, %9 : vector<16x16xi32>
    %11 = vector.shape_cast %10 : vector<16x16xi32> to vector<16x16x1xi32>
    %12 = vector.broadcast %0 : vector<1x1x160xi32> to vector<16x16x160xi32>
    %13 = vector.broadcast %11 : vector<16x16x1xi32> to vector<16x16x160xi32>
    %14 = arith.cmpi eq, %12, %13 : vector<16x16x160xi32>
    %15 = arith.ori %7, %14 : vector<16x16x160xi1>
    %c0_2 = arith.constant 0 : index
    %c2 = arith.constant 2 : index
    %16 = vector.load %arg1[%c0_2, %c2] : memref<16x20xi32, #tpu.memory_space<vmem>>, vector<16x16xi32>
    %c64_i32 = arith.constant 64 : i32
    %17 = vector.broadcast %c64_i32 : i32 to vector<16x16xi32>
    %18 = arith.addi %16, %17 : vector<16x16xi32>
    %19 = vector.shape_cast %18 : vector<16x16xi32> to vector<16x16x1xi32>
    %20 = vector.broadcast %0 : vector<1x1x160xi32> to vector<16x16x160xi32>
    %21 = vector.broadcast %19 : vector<16x16x1xi32> to vector<16x16x160xi32>
    %22 = arith.cmpi eq, %20, %21 : vector<16x16x160xi32>
    %23 = arith.ori %15, %22 : vector<16x16x160xi1>
    %c0_3 = arith.constant 0 : index
    %c3 = arith.constant 3 : index
    %24 = vector.load %arg1[%c0_3, %c3] : memref<16x20xi32, #tpu.memory_space<vmem>>, vector<16x16xi32>
    %c96_i32 = arith.constant 96 : i32
    %25 = vector.broadcast %c96_i32 : i32 to vector<16x16xi32>
    %26 = arith.addi %24, %25 : vector<16x16xi32>
    %27 = vector.shape_cast %26 : vector<16x16xi32> to vector<16x16x1xi32>
    %28 = vector.broadcast %0 : vector<1x1x160xi32> to vector<16x16x160xi32>
    %29 = vector.broadcast %27 : vector<16x16x1xi32> to vector<16x16x160xi32>
    %30 = arith.cmpi eq, %28, %29 : vector<16x16x160xi32>
    %31 = arith.ori %23, %30 : vector<16x16x160xi1>
    %c0_4 = arith.constant 0 : index
    %c4 = arith.constant 4 : index
    %32 = vector.load %arg1[%c0_4, %c4] : memref<16x20xi32, #tpu.memory_space<vmem>>, vector<16x16xi32>
    %c128_i32 = arith.constant 128 : i32
    %33 = vector.broadcast %c128_i32 : i32 to vector<16x16xi32>
    %34 = arith.addi %32, %33 : vector<16x16xi32>
    %35 = vector.shape_cast %34 : vector<16x16xi32> to vector<16x16x1xi32>
    %36 = vector.broadcast %0 : vector<1x1x160xi32> to vector<16x16x160xi32>
    %37 = vector.broadcast %35 : vector<16x16x1xi32> to vector<16x16x160xi32>
    %38 = arith.cmpi eq, %36, %37 : vector<16x16x160xi32>
    %39 = arith.ori %31, %38 : vector<16x16x160xi1>
    %40 = arith.extui %39 : vector<16x16x160xi1> to vector<16x16x160xi32>
    %41 = arith.sitofp %40 : vector<16x16x160xi32> to vector<16x16x160xf32>
    %42 = vector.shape_cast %41 : vector<16x16x160xf32> to vector<256x160xf32>
    %c0_5 = arith.constant 0 : index
    %c0_6 = arith.constant 0 : index
    %43 = vector.load %arg2[%c0_5, %c0_6] : memref<160x32xf32, #tpu.memory_space<vmem>>, vector<160x32xf32>
    %cst = arith.constant dense<0.000000e+00> : vector<256x32xf32>
    %44 = tpu.matmul %42, %43, %cst {dimension_numbers = #tpu.dot_dimension_numbers<[1], [0], [0], [1], [0, 0, 1, 1], [], []>} : vector<256x160xf32>, vector<160x32xf32>, vector<256x32xf32> -> vector<256x32xf32>
    %45 = vector.shape_cast %44 : vector<256x32xf32> to vector<16x16x32xf32>
    %cst_7 = arith.constant dense<0xFF800000> : vector<16x32xf32>
    %46 = vector.multi_reduction <maximumf>, %45, %cst_7 [1] : vector<16x16x32xf32> to vector<16x32xf32>
    %c0_8 = arith.constant 0 : index
    %c0_9 = arith.constant 0 : index
    %47 = vector.load %arg3[%c0_8, %c0_9] : memref<1x32xf32, #tpu.memory_space<vmem>>, vector<1x32xf32>
    %48 = vector.broadcast %47 : vector<1x32xf32> to vector<16x32xf32>
    %49 = arith.addf %46, %48 : vector<16x32xf32>
    %c0_10 = arith.constant 0 : index
    %c0_11 = arith.constant 0 : index
    %50 = vector.load %arg4[%c0_10, %c0_11] : memref<16x32xf32, #tpu.memory_space<vmem>>, vector<16x32xf32>
    tpu.vector_store %arg4[%c0_10, %c0_11], %49 {strides = array<i32>} : memref<16x32xf32, #tpu.memory_space<vmem>>, vector<16x32xf32>,
    return
  }
  func.func @transform_0(%arg0: i32) -> (i32, i32) {
    %c0_i32 = arith.constant 0 : i32
    %c0_i32_0 = arith.constant 0 : i32
    return %arg0, %c0_i32 : i32, i32
  }
  func.func @transform_1(%arg0: i32) -> (i32, i32) {
    %c0_i32 = arith.constant 0 : i32
    %c0_i32_0 = arith.constant 0 : i32
    %c0_i32_1 = arith.constant 0 : i32
    return %c0_i32, %c0_i32_0 : i32, i32
  }
  func.func @transform_2(%arg0: i32) -> (i32, i32) {
    %c0_i32 = arith.constant 0 : i32
    %c0_i32_0 = arith.constant 0 : i32
    %c0_i32_1 = arith.constant 0 : i32
    return %c0_i32, %c0_i32_0 : i32, i32
  }
  func.func @transform_3(%arg0: i32) -> (i32, i32) {
    %c0_i32 = arith.constant 0 : i32
    %c0_i32_0 = arith.constant 0 : i32
    return %arg0, %c0_i32 : i32, i32
  }
}

</mosaic_0001>

<bundles_post_ra>
// kernel: tpu_custom_call.1
= control target key start
LH: loop header
LB: loop body
LE: loop exit
PB: predicated region body
PF: predicated region fallthrough
CT: control target
= control target key end

     0   :  { %8 = vsyncpa [#allocation3], 0  ;;  %s4286_s0 = inlined_call_operand.vmem [shape: s32[32,20], index: 0, kind: input, shape index: {}]   ;;  %s4287_s1 = inlined_call_operand.vmem [shape: f32[160,32], index: 1, kind: input, shape index: {}]   ;;  %s4288_s2 = inlined_call_operand.vmem [shape: f32[1,32], index: 2, kind: input, shape index: {}]   ;;  %s4289_s3 = inlined_call_operand.hbm [shape: f32[32,32], index: 3, kind: output, shape index: {}]  }
   0x1   :  { %10 = vsyncpa [#allocation3 + $0x1], 0  ;;  %s2767_s12 = smov 0   ;;  %s2769_s13 = smov 0  }
   0x2   :  { %s2771_s14 = smov 0   ;;  %s2773_s15 = smov 0  }
   0x3 LB: > { %s2788_s16 = sadd.s32 4294967295, %s2740_s15   ;;  %s2473_s17 = sadd.s32 4294967294, %s2740_s15   ;;  %s2740_s15 = sphi %s2773_s15, %s4489_s15   ;;  %s2736_s14 = sphi %s2771_s14, %s4488_s14   ;;  %s2732_s13 = sphi %s2769_s13, %s4487_s13   ;;  %s2728_s12 = sphi %s2767_s12, %s4486_s12  }
   0x4   : > { %s2792_s18 = sadd.s32 1, %s2740_s15   ;;  %s91_s19 = sadd.s32 1, %s2736_s14 }
   0x5   : > { %s88_s20 = ssub.s32 %s2740_s15, %s2792_s18  ;;  %p101_p0 = scmp.ne.s32.totalorder %s2736_s14, %s2732_s13 }
   0x6   : > { %p89_p1 = scmp.eq.s32.totalorder %s88_s20, 0  ;;  %p102_p2 = scmp.eq.s32.totalorder %s2788_s16, 1 }
   0x7   : > { %p107_p3 = scmp.ne.s32.totalorder %s2732_s13, %s2728_s12  ;;  %p108_p4 = scmp.eq.s32.totalorder %s2473_s17, 1 }
   0x8   : > { %s2803_s21 = scalar_select %p89_p1, %s2736_s14, %s91_s19  }
   0x9   : > { %p2805_p5 = por %p102_p2, %p101_p0  ;;  %p2809_p6 = por %p108_p4, %p107_p3 }
   0xa   : > { %p2476_p7 = scmp.ge.s32.totalorder %s2740_s15, 1  ;;  %p141_p8 = scmp.lt.s32.totalorder %s2740_s15, 3 }
   0xc   : > { %p142_p9 = pnand %p2476_p7, %p141_p8 }
   0xd   : > { %s2478_s24 = sshll.u32 (!%p142_p9), %s2788_s16, 1  ;;  %v172_v0 = vlaneseq (!%p142_p9)  ;;  %v1833_v1 = vld [vmem:[%s4287_s1] sm:$0xff] (!%p142_p9)  ;;  %v1834_v2 = vld [vmem:[%s4287_s1 + $0x8] sm:$0xff] (!%p142_p9)  ;;  %v1835_v3 = vld [vmem:[%s4287_s1 + $0x10] sm:$0xff] (!%p142_p9)  ;;  %v2742_v4 = vmov (!%p142_p9), 0.0|0.0   ;;  %s162_s8 = sand.u32 (!%p142_p9), 1, %s2732_s13  }
   0xe   : > { %145 = sbr.rel (%p142_p9) target bundleno = 713 (0x2c9), region = 32  ;;  %p166_p10 = scmp.lt.s32.totalorder (!%p142_p9), %s2478_s24, 3  ;;  %2583 = vmatprep.subr.bf16.mxu0 (!%p142_p9), %v2742_v4  ;;  %v2584_v5 = vpack.c.bf16 (!%p142_p9), %v1834_v2, %v1833_v1  ;;  %2613 = vmatprep.subr.bf16.mxu1 (!%p142_p9), %v2742_v4  ;;  %v1836_v6 = vld [vmem:[%s4287_s1 + $0x18] sm:$0xff] (!%p142_p9)  ;;  %v1837_v10 = vld [vmem:[%s4287_s1 + $0x20] sm:$0xff] (!%p142_p9)  ;;  %v1838_v11 = vld [vmem:[%s4287_s1 + $0x28] sm:$0xff] (!%p142_p9) }
   0xf   : > { %v2831_v7 = vshrl.u32 (!%p142_p9), %v172_v0, 7  ;;  %v2587_v8 = vpack.c.bf16 (!%p142_p9), %v1836_v6, %v1835_v3  ;;  %v2590_v14 = vpack.c.bf16 (!%p142_p9), %v1838_v11, %v1837_v10  ;;  %v1839_v21 = vld [vmem:[%s4287_s1 + $0x30] sm:$0xff] (!%p142_p9)  ;;  %v1840_v22 = vld [vmem:[%s4287_s1 + $0x38] sm:$0xff] (!%p142_p9)  ;;  %v1841_v28 = vld [vmem:[%s4287_s1 + $0x40] sm:$0xff] (!%p142_p9)  ;;  %s2477_s9 = sshll.u32 (!%p142_p9), %s162_s8, 4  ;;  %s2744_s27 = smov (!%p142_p9), [#allocation2]  }
  0x10   : > { %2585 = vmatpush1.bf16.msra.mxu0 (!%p142_p9), %v2584_v5  ;;  %2623 = vmatpush1.bf16.msra.mxu1 (!%p142_p9), %v2584_v5  ;;  %v2593_v25 = vpack.c.bf16 (!%p142_p9), %v1840_v22, %v1839_v21  ;;  %v1842_v29 = vld [vmem:[%s4287_s1 + $0x48] sm:$0xff] (!%p142_p9)  ;;  %v1843_v35 = vld [vmem:[%s4287_s1 + $0x50] sm:$0xff] (!%p142_p9)  ;;  %v1844_v36 = vld [vmem:[%s4287_s1 + $0x58] sm:$0xff] (!%p142_p9)  ;;  %s164_s11 = scalar_lea.vmem (!%p142_p9), [#allocation2], %s2477_s9  ;;  %s2682_s28 = sshll.u32 (!%p142_p9), %s2744_s27, 4  ;;  %s2683_s28 = int_to_ptr.vmem [resolvable:$false] %s2682_s28 }
  0x11   : > { %v179_v9 = vsub.s32 (!%p142_p9), 0, %v2831_v7  ;;  %2586 = vmatprep.subr.bf16.mxu0 (!%p142_p9), %v2742_v4  ;;  %2614 = vmatprep.subr.bf16.mxu1 (!%p142_p9), %v2742_v4  ;;  %v2596_v32 = vpack.c.bf16 (!%p142_p9), %v1842_v29, %v1841_v28  ;;  %v2599_v39 = vpack.c.bf16 (!%p142_p9), %v1844_v36, %v1843_v35  ;;  %v1845_v41 = vld [vmem:[%s4287_s1 + $0x60] sm:$0xff] (!%p142_p9)  ;;  %v1846_v42 = vld [vmem:[%s4287_s1 + $0x68] sm:$0xff] (!%p142_p9)  ;;  %v1847_v45 = vld [vmem:[%s4287_s1 + $0x70] sm:$0xff] (!%p142_p9)  ;;  %v190_v54 = vsub.s32 (!%p142_p9), 1, %v2831_v7  ;;  %s2411_s17 = sshll.u32 (!%p142_p9), %s164_s11, 4  ;;  %s4241_s17 = int_to_ptr.vmem [resolvable:$true] %s2411_s17 }
  0x12   : > { %v2602_v44 = vpack.c.bf16 (!%p142_p9), %v1846_v42, %v1845_v41  ;;  %v1848_v46 = vld [vmem:[%s4287_s1 + $0x78] sm:$0xff] (!%p142_p9)  ;;  %v1849_v48 = vld [vmem:[%s4287_s1 + $0x80] sm:$0xff] (!%p142_p9)  ;;  %v1850_v49 = vld [vmem:[%s4287_s1 + $0x88] sm:$0xff] (!%p142_p9)  ;;  %v201_v2 = vsub.s32 (!%p142_p9), 2, %v2831_v7  ;;  %s2678_s26 = scalar_lea.vmem (!%p142_p9), %s4241_s17, 256  ;;  %s2684_s29 = scalar_lea.vmem (!%p142_p9), %s2683_s28, 512 }
  0x13   : > { %v2605_v47 = vpack.c.bf16 (!%p142_p9), %v1848_v46, %v1847_v45  ;;  %v2608_v50 = vpack.c.bf16 (!%p142_p9), %v1850_v49, %v1849_v48  ;;  %v1851_v51 = vld [vmem:[%s4287_s1 + $0x90] sm:$0xff] (!%p142_p9)  ;;  %v1852_v52 = vld [vmem:[%s4287_s1 + $0x98] sm:$0xff] (!%p142_p9)  ;;  %p2679_p11 = scmp.ne.s32.totalorder (!%p142_p9), %s4241_s17, %s2678_s26  ;;  %p2685_p0 = scmp.lt.s32.totalorder (!%p142_p9), %s4241_s17, %s2683_s28 }
  0x14   : > { %2588 = vmatpush1.bf16.msra.mxu0 (!%p142_p9), %v2587_v8  ;;  %2624 = vmatpush1.bf16.msra.mxu1 (!%p142_p9), %v2587_v8  ;;  %v2611_v53 = vpack.c.bf16 (!%p142_p9), %v1852_v52, %v1851_v51  ;;  %v2743_v51 = vmov (!%p142_p9), 0.0   ;;  %p2686_p1 = scmp.lt.s32.totalorder (!%p142_p9), %s2684_s29, %s2678_s26 }
  0x15   : > { %s4491_s24 = smov (!%p166_p10, %s2478_s24), 3  ;;  %2589 = vmatprep.subr.bf16.mxu0 %v2742_v4  ;;  %2615 = vmatprep.subr.bf16.mxu1 %v2742_v4  ;;  %p2680_p12 = pnand %p2679_p11, %p2805_p5 }
  0x16   : > { %s2479_s10 = sshll.u32 %s4491_s24, 3  ;;  %p2687_p2 = por %p2686_p1, %p2685_p0 }
  0x17   : > { %s2845_s19 = scalar_lea.vmem %s4286_s0, %s2479_s10  ;;  %s2582_s10 = sshll.u32 %s2788_s16, 8 }
  0x18   : > { %v2848_v12 = vld [vmem:[%s2845_s19] sm:$0xff]  ;;  %v2851_v13 = vld [vmem:[%s2845_s19 + $0x8] sm:$0xff]  ;;  %2591 = vmatpush1.bf16.msra.mxu0 %v2590_v14  ;;  %2625 = vmatpush1.bf16.msra.mxu1 %v2590_v14  ;;  %s4239_s25 = scalar_lea.hbm %s4289_s3, %s2582_s10  ;;  %s4245_s16 = scalar_lea.sflag [#allocation3], %s162_s8 }
  0x19   : > { %v180_v15 = vrot.slane %v2848_v12, %v179_v9  ;;  %v2855_v16 = vadd.s32 32, %v2848_v12  ;;  %v2858_v17 = vadd.s32 32, %v2851_v13  ;;  %v268_v19 = vrot.slane %v2851_v13, %v179_v9  ;;  %2592 = vmatprep.subr.bf16.mxu0 %v2742_v4  ;;  %2616 = vmatprep.subr.bf16.mxu1 %v2742_v4  ;;  %p2681_p13 = pneg %p2680_p12 }
  0x1a   : > { %v2867_v20 = vadd.s32 64, %v2848_v12  ;;  %v2880_v24 = vadd.s32 64, %v2851_v13  ;;  %v2884_v27 = vadd.s32 96, %v2848_v12  ;;  %v2896_v31 = vadd.s32 96, %v2851_v13 }
  0x1b   : > { %182 = vbcast.lane.b32.xlu0 %v180_v15, 256  ;;  %v2863_v18 = vrot.slane %v2855_v16, %v179_v9  ;;  %v2877_v23 = vrot.slane %v2858_v17, %v179_v9  ;;  %v2901_v34 = vadd.s32 128, %v2848_v12  ;;  %v2913_v38 = vadd.s32 128, %v2851_v13  ;;  %p2688_p3 = pnand %p2687_p2, %p2681_p13 }
  0x1c   : > { %v744_v26 = vrot.slane %v2867_v20, %v179_v9  ;;  %v840_v30 = vrot.slane %v2880_v24, %v179_v9  ;;  %2594 = vmatpush1.bf16.msra.mxu0 %v2593_v25  ;;  %v1066_v33 = vrot.slane %v2884_v27, %v179_v9  ;;  %2626 = vmatpush1.bf16.msra.mxu1 %v2593_v25 }
  0x1d   : > { %425 = vbcast.lane.b32.xlu1 %v2863_v18, 257  ;;  %2595 = vmatprep.subr.bf16.mxu0 %v2742_v4  ;;  %v1162_v37 = vrot.slane %v2896_v31, %v179_v9  ;;  %v1388_v40 = vrot.slane %v2901_v34, %v179_v9  ;;  %v1484_v43 = vrot.slane %v2913_v38, %v179_v9 }
  0x1e   : > { %2617 = vmatprep.subr.bf16.mxu1 %v2742_v4  ;;  %v191_v55 = vrot.slane %v2848_v12, %v190_v54  ;;  %v279_v56 = vrot.slane %v2851_v13, %v190_v54  ;;  %v434_v57 = vrot.slane %v2855_v16, %v190_v54  ;;  %v530_v58 = vrot.slane %v2858_v17, %v190_v54 }
  0x1f   : > { %270 = vbcast.lane.b32.xlu0 %v268_v19, 256  ;;  %v756_v59 = vrot.slane %v2867_v20, %v190_v54  ;;  %v852_v60 = vrot.slane %v2880_v24, %v190_v54  ;;  %v1078_v61 = vrot.slane %v2884_v27, %v190_v54  ;;  %v1174_v62 = vrot.slane %v2896_v31, %v190_v54 }
  0x20   : > { %2597 = vmatpush1.bf16.msra.mxu0 %v2596_v32  ;;  %2627 = vmatpush1.bf16.msra.mxu1 %v2596_v32  ;;  %v1400_v63 = vrot.slane %v2901_v34, %v190_v54  ;;  %v1496_v1 = vrot.slane %v2913_v38, %v190_v54  ;;  %v202_v3 = vrot.slane %v2848_v12, %v201_v2 }
  0x21   : > { %521 = vbcast.lane.b32.xlu1 %v2877_v23, 257  ;;  %2598 = vmatprep.subr.bf16.mxu0 %v2742_v4  ;;  %v446_v5 = vrot.slane %v2855_v16, %v201_v2  ;;  %v542_v6 = vrot.slane %v2858_v17, %v201_v2  ;;  %v768_v8 = vrot.slane %v2867_v20, %v201_v2 }
  0x22   : > { %2618 = vmatprep.subr.bf16.mxu1 %v2742_v4  ;;  %v864_v9 = vrot.slane %v2880_v24, %v201_v2  ;;  %v1090_v10 = vrot.slane %v2884_v27, %v201_v2  ;;  %v1186_v11 = vrot.slane %v2896_v31, %v201_v2  ;;  %v1412_v14 = vrot.slane %v2901_v34, %v201_v2 }
  0x23   : > { %747 = vbcast.lane.b32.xlu0 %v744_v26, 258 }
  0x24   : > { %2600 = vmatpush1.bf16.msra.mxu0 %v2599_v39  ;;  %2628 = vmatpush1.bf16.msra.mxu1 %v2599_v39 }
  0x25   : > { %843 = vbcast.lane.b32.xlu1 %v840_v30, 258  ;;  %2601 = vmatprep.subr.bf16.mxu0 %v2742_v4 }
  0x26   : > { %2619 = vmatprep.subr.bf16.mxu1 %v2742_v4 }
  0x27   : > { %1069 = vbcast.lane.b32.xlu0 %v1066_v33, 259 }
  0x28   : > { %2603 = vmatpush1.bf16.msra.mxu0 %v2602_v44  ;;  %2629 = vmatpush1.bf16.msra.mxu1 %v2602_v44 }
  0x29   : > { %1165 = vbcast.lane.b32.xlu1 %v1162_v37, 259  ;;  %2604 = vmatprep.subr.bf16.mxu0 %v2742_v4 }
  0x2a   : > { %2620 = vmatprep.subr.bf16.mxu1 %v2742_v4 }
  0x2b   : > { %1391 = vbcast.lane.b32.xlu0 %v1388_v40, 260 }
  0x2c   : > { %2606 = vmatpush1.bf16.msra.mxu0 %v2605_v47  ;;  %2630 = vmatpush1.bf16.msra.mxu1 %v2605_v47 }
  0x2d   : > { %1487 = vbcast.lane.b32.xlu1 %v1484_v43, 260  ;;  %2607 = vmatprep.subr.bf16.mxu0 %v2742_v4 }
  0x2e   : > { %2621 = vmatprep.subr.bf16.mxu1 %v2742_v4 }
  0x2f   : > { %186 = vbcast.lane.b32.xlu0 %v180_v15, 264  ;;  %v1508_v15 = vrot.slane %v2913_v38, %v201_v2 }
  0x30   : > { %2609 = vmatpush1.bf16.msra.mxu0 %v2608_v50  ;;  %2631 = vmatpush1.bf16.msra.mxu1 %v2608_v50 }
  0x31   : > { %274 = vbcast.lane.b32.xlu1 %v268_v19, 264  ;;  %2610 = vmatprep.subr.bf16.mxu0 %v2742_v4  ;;  %v2979_v19 = vsub.s32 3, %v2831_v7 }
  0x32   : > { %2622 = vmatprep.subr.bf16.mxu1 %v2742_v4  ;;  %v290_v4 = vrot.slane %v2851_v13, %v201_v2 }
  0x33   : > { %429 = vbcast.lane.b32.xlu0 %v2863_v18, 265  ;;  %v2976_v18 = vand.u32 127, %v172_v0  ;;  %v2986_v25 = vrot.slane %v2848_v12, %v2979_v19  ;;  %v3036_v41 = vrot.slane %v2880_v24, %v2979_v19  ;;  %v3056_v46 = vrot.slane %v2896_v31, %v2979_v19 }
  0x34   : > { %2612 = vmatpush1.bf16.msra.mxu0 %v2611_v53  ;;  %2632 = vmatpush1.bf16.msra.mxu1 %v2611_v53  ;;  %v3073_v50 = vrot.slane %v2901_v34, %v2979_v19 }
  0x35   : > { %525 = vbcast.lane.b32.xlu1 %v2877_v23, 265  ;;  %v2982_v21 = vadd.s32 128, %v2976_v18 }
  0x37   : > { %751 = vbcast.lane.b32.xlu0 %v744_v26, 266  ;;  %v2994_v26 = vrot.slane %v2851_v13, %v2979_v19 }
  0x39   : > { %847 = vbcast.lane.b32.xlu1 %v840_v30, 266  ;;  %v3005_v30 = vrot.slane %v2855_v16, %v2979_v19 }
  0x3b   : > { %1073 = vbcast.lane.b32.xlu0 %v1066_v33, 267  ;;  %v3012_v33 = vrot.slane %v2858_v17, %v2979_v19 }
  0x3d   : > { %1169 = vbcast.lane.b32.xlu1 %v1162_v37, 267  ;;  %v3025_v37 = vrot.slane %v2867_v20, %v2979_v19 }
  0x3f   : > { %1395 = vbcast.lane.b32.xlu0 %v1388_v40, 268 }
  0x41   : > { %1491 = vbcast.lane.b32.xlu1 %v1484_v43, 268  ;;  %v3043_v43 = vrot.slane %v2884_v27, %v2979_v19 }
  0x43   : > { %193 = vbcast.lane.b32.xlu0 %v191_v55, 256 }
  0x45   : > { %281 = vbcast.lane.b32.xlu1 %v279_v56, 256 }
  0x47   : > { %437 = vbcast.lane.b32.xlu0 %v434_v57, 257 }
  0x49   : > { %533 = vbcast.lane.b32.xlu1 %v530_v58, 257 }
  0x4b   : > { %759 = vbcast.lane.b32.xlu0 %v756_v59, 258 }
  0x4d   : > { %855 = vbcast.lane.b32.xlu1 %v852_v60, 258 }
  0x4f   : > { %1081 = vbcast.lane.b32.xlu0 %v1078_v61, 259 }
  0x51   : > { %1177 = vbcast.lane.b32.xlu1 %v1174_v62, 259 }
  0x53   : > { %1403 = vbcast.lane.b32.xlu0 %v1400_v63, 260 }
  0x55   : > { %1499 = vbcast.lane.b32.xlu1 %v1496_v1, 260 }
  0x57   : > { %197 = vbcast.lane.b32.xlu0 %v191_v55, 264  ;;  %v3087_v55 = vrot.slane %v2913_v38, %v2979_v19 }
  0x59   : > { %285 = vbcast.lane.b32.xlu1 %v279_v56, 264 }
  0x5b   : > { %441 = vbcast.lane.b32.xlu0 %v434_v57, 265 }
  0x5d   : > { %537 = vbcast.lane.b32.xlu1 %v530_v58, 265 }
  0x5f   : > { %763 = vbcast.lane.b32.xlu0 %v756_v59, 266 }
  0x61   : > { %859 = vbcast.lane.b32.xlu1 %v852_v60, 266 }
  0x63   : > { %1085 = vbcast.lane.b32.xlu0 %v1078_v61, 267 }
  0x65   : > { %1181 = vbcast.lane.b32.xlu1 %v1174_v62, 267 }
  0x67   : > { %1407 = vbcast.lane.b32.xlu0 %v1400_v63, 268 }
  0x69   : > { %1503 = vbcast.lane.b32.xlu1 %v1496_v1, 268 }
  0x6b   : > { %204 = vbcast.lane.b32.xlu0 %v202_v3, 256 }
  0x6d   : > { %292 = vbcast.lane.b32.xlu1 %v290_v4, 256 }
  0x6f   : > { %449 = vbcast.lane.b32.xlu0 %v446_v5, 257 }
  0x71   : > { %545 = vbcast.lane.b32.xlu1 %v542_v6, 257 }
  0x73   : > { %771 = vbcast.lane.b32.xlu0 %v768_v8, 258 }
  0x75   : > { %867 = vbcast.lane.b32.xlu1 %v864_v9, 258 }
  0x77   : > { %1093 = vbcast.lane.b32.xlu0 %v1090_v10, 259 }
  0x79   : > { %1189 = vbcast.lane.b32.xlu1 %v1186_v11, 259 }
  0x7b   : > { %1415 = vbcast.lane.b32.xlu0 %v1412_v14, 260 }
  0x7d   : > { %1511 = vbcast.lane.b32.xlu1 %v1508_v15, 260 }
  0x7f   : > { %208 = vbcast.lane.b32.xlu0 %v202_v3, 264 }
  0x81   : > { %296 = vbcast.lane.b32.xlu1 %v290_v4, 264 }
  0x83   : > { %453 = vbcast.lane.b32.xlu0 %v446_v5, 265 }
  0x85   : > { %549 = vbcast.lane.b32.xlu1 %v542_v6, 265 }
  0x87   : > { %775 = vbcast.lane.b32.xlu0 %v768_v8, 266 }
  0x89   : > { %871 = vbcast.lane.b32.xlu1 %v864_v9, 266  ;;  %v3142_v9 = vsub.s32 4, %v2831_v7 }
  0x8b   : > { %1097 = vbcast.lane.b32.xlu0 %v1090_v10, 267  ;;  %v3228_v44 = vrot.slane %v2884_v27, %v3142_v9  ;;  %v3245_v48 = vrot.slane %v2896_v31, %v3142_v9 }
  0x8d   : > { %1193 = vbcast.lane.b32.xlu1 %v1186_v11, 267  ;;  %v183_v22 = vpop.permute.xlu0 %182 }
  0x8e   : > { %vm353_vm0 = vcmp.eq.s32.totalorder %v2976_v18, %v183_v22  ;;  %vm354_vm2 = vcmp.eq.s32.totalorder %v2982_v21, %v183_v22 }
  0x8f   : > { %v426_v23 = vpop.permute.xlu1 %425  ;;  %1419 = vbcast.lane.b32.xlu0 %v1412_v14, 268 }
  0x90   : > { %vm611_vm1 = vcmp.eq.s32.totalorder %v2976_v18, %v426_v23  ;;  %vm612_vm3 = vcmp.eq.s32.totalorder %v2982_v21, %v426_v23  ;;  %v3160_v23 = vrot.slane %v2848_v12, %v3142_v9 }
  0x91   : > { %1515 = vbcast.lane.b32.xlu1 %v1508_v15, 268  ;;  %v271_v0 = vpop.permute.xlu0 %270  ;;  %vm2997_vm5 = vmor %vm353_vm0, %vm611_vm1 }
  0x92   : > { %vm385_vm4 = vcmp.eq.s32.totalorder %v2976_v18, %v271_v0  ;;  %vm386_vm6 = vcmp.eq.s32.totalorder %v2982_v21, %v271_v0  ;;  %vm676_vm9 = vmor %vm354_vm2, %vm612_vm3  ;;  %v3165_v0 = vrot.slane %v2851_v13, %v3142_v9 }
  0x93   : > { %v522_v29 = vpop.permute.xlu1 %521  ;;  %215 = vbcast.lane.b32.xlu0 %v2986_v25, 256 }
  0x94   : > { %vm643_vm7 = vcmp.eq.s32.totalorder %v2976_v18, %v522_v29  ;;  %vm644_vm8 = vcmp.eq.s32.totalorder %v2982_v21, %v522_v29  ;;  %v3178_v29 = vrot.slane %v2855_v16, %v3142_v9 }
  0x95   : > { %vm707_vm10 = vmor %vm385_vm4, %vm643_vm7  ;;  %303 = vbcast.lane.b32.xlu1 %v2994_v26, 256  ;;  %v748_v32 = vpop.permute.xlu0 %747 }
  0x96   : > { %vm933_vm11 = vcmp.eq.s32.totalorder %v2976_v18, %v748_v32  ;;  %vm934_vm12 = vcmp.eq.s32.totalorder %v2982_v21, %v748_v32  ;;  %vm708_vm13 = vmor %vm386_vm6, %vm644_vm8 }
  0x97   : > { %vm3018_vm14 = vmor %vm2997_vm5, %vm933_vm11  ;;  %v844_v36 = vpop.permute.xlu1 %843  ;;  %461 = vbcast.lane.b32.xlu0 %v3005_v30, 257 }
  0x98   : > { %vm965_vm15 = vcmp.eq.s32.totalorder %v2976_v18, %v844_v36  ;;  %vm966_vm0 = vcmp.eq.s32.totalorder %v2982_v21, %v844_v36  ;;  %vm998_vm1 = vmor %vm676_vm9, %vm934_vm12 }
  0x99   : > { %vm3029_vm2 = vmor %vm707_vm10, %vm965_vm15  ;;  %557 = vbcast.lane.b32.xlu1 %v3012_v33, 257  ;;  %v1070_v40 = vpop.permute.xlu0 %1069 }
  0x9a   : > { %vm1255_vm3 = vcmp.eq.s32.totalorder %v2976_v18, %v1070_v40  ;;  %vm1256_vm4 = vcmp.eq.s32.totalorder %v2982_v21, %v1070_v40  ;;  %vm1030_vm5 = vmor %vm708_vm13, %vm966_vm0  ;;  %vm4290_vm13 = vcmask 261120  }
  0x9b   : > { %v1166_v42 = vpop.permute.xlu1 %1165  ;;  %783 = vbcast.lane.b32.xlu0 %v3025_v37, 258  ;;  %vm1320_vm6 = vmor %vm998_vm1, %vm1256_vm4 }
  0x9c   : > { %vm1287_vm7 = vcmp.eq.s32.totalorder %v2976_v18, %v1166_v42  ;;  %vm3048_vm8 = vmor %vm3018_vm14, %vm1255_vm3  ;;  %vm1288_vm9 = vcmp.eq.s32.totalorder %v2982_v21, %v1166_v42 }
  0x9d   : > { %879 = vbcast.lane.b32.xlu1 %v3036_v41, 258  ;;  %v1392_v45 = vpop.permute.xlu0 %1391  ;;  %vm3058_vm10 = vmor %vm1030_vm5, %vm1288_vm9 }
  0x9e   : > { %vm1577_vm11 = vcmp.eq.s32.totalorder %v2976_v18, %v1392_v45  ;;  %vm1578_vm12 = vcmp.eq.s32.totalorder %v2982_v21, %v1392_v45  ;;  %vm3066_vm14 = vmor %vm3029_vm2, %vm1287_vm7 }
  0x9f   : > { %v1488_v49 = vpop.permute.xlu1 %1487  ;;  %1105 = vbcast.lane.b32.xlu0 %v3043_v43, 259  ;;  %vm1642_vm15 = vmor %vm1320_vm6, %vm1578_vm12 }
  0xa0   : > { %vm1609_vm0 = vcmp.eq.s32.totalorder %v2976_v18, %v1488_v49  ;;  %v2481_v52 = vsel %vm1642_vm15, 1.0, %v2743_v51  ;;  %vm1641_vm1 = vmor %vm3048_vm8, %vm1577_vm11  ;;  %vm1610_vm2 = vcmp.eq.s32.totalorder %v2982_v21, %v1488_v49 }
  0xa1   : > { %1201 = vbcast.lane.b32.xlu1 %v3056_v46, 259  ;;  %2544 = vmatprep.mubr.msk.f32.mxu0 %vm4290_vm13, %v2481_v52  ;;  %v187_v53 = vpop.permute.xlu0 %186  ;;  %v2480_v54 = vsel %vm1641_vm1, 1.0, %v2743_v51  ;;  %vm1674_vm3 = vmor %vm3058_vm10, %vm1610_vm2  ;;  %v3260_v52 = vrot.slane %v2901_v34, %v3142_v9 }
  0xa2   : > { %2015 = vmatmul.mubr.f32.vlgmr.msra.gmra.mrb[0].mxu0 %v2480_v54  ;;  %v2513_v56 = vsel %vm1674_vm3, 1.0, %v2743_v51  ;;  %vm1673_vm4 = vmor %vm3066_vm14, %vm1609_vm0  ;;  %vm355_vm5 = vcmp.eq.s32.totalorder %v2976_v18, %v187_v53  ;;  %vm356_vm8 = vcmp.eq.s32.totalorder %v2982_v21, %v187_v53 }
  0xa3   : > { %v275_v57 = vpop.permute.xlu1 %274  ;;  %1427 = vbcast.lane.b32.xlu0 %v3073_v50, 260  ;;  %2560 = vmatprep.mubr.msk.f32.mxu1 %vm4290_vm13, %v2513_v56  ;;  %v2512_v58 = vsel %vm1673_vm4, 1.0, %v2743_v51  ;;  %v3274_v56 = vrot.slane %v2913_v38, %v3142_v9 }
  0xa4   : > { %2095 = vmatmul.mubr.f32.vlgmr.msra.gmra.mrb[0].mxu1 %v2512_v58  ;;  %vm387_vm10 = vcmp.eq.s32.totalorder %v2976_v18, %v275_v57  ;;  %vm388_vm15 = vcmp.eq.s32.totalorder %v2982_v21, %v275_v57 }
  0xa5   : > { %1523 = vbcast.lane.b32.xlu1 %v3087_v55, 260  ;;  %v430_v59 = vpop.permute.xlu0 %429 }
  0xa6   : > { %vm613_vm6 = vcmp.eq.s32.totalorder %v2976_v18, %v430_v59  ;;  %vm614_vm7 = vcmp.eq.s32.totalorder %v2982_v21, %v430_v59 }
  0xa7   : > { %vm677_vm9 = vmor %vm355_vm5, %vm613_vm6  ;;  %v526_v60 = vpop.permute.xlu1 %525  ;;  %219 = vbcast.lane.b32.xlu0 %v2986_v25, 264 }
  0xa8   : > { %vm678_vm11 = vmor %vm356_vm8, %vm614_vm7  ;;  %vm645_vm12 = vcmp.eq.s32.totalorder %v2976_v18, %v526_v60  ;;  %vm646_vm14 = vcmp.eq.s32.totalorder %v2982_v21, %v526_v60 }
  0xa9   : > { %vm709_vm0 = vmor %vm387_vm10, %vm645_vm12  ;;  %307 = vbcast.lane.b32.xlu1 %v2994_v26, 264  ;;  %v752_v61 = vpop.permute.xlu0 %751 }
  0xaa   : > { %vm710_vm1 = vmor %vm388_vm15, %vm646_vm14  ;;  %vm935_vm2 = vcmp.eq.s32.totalorder %v2976_v18, %v752_v61  ;;  %vm936_vm3 = vcmp.eq.s32.totalorder %v2982_v21, %v752_v61 }
  0xab   : > { %vm3108_vm4 = vmor %vm677_vm9, %vm935_vm2  ;;  %v848_v63 = vpop.permute.xlu1 %847  ;;  %465 = vbcast.lane.b32.xlu0 %v3005_v30, 265 }
  0xac   : > { %vm1000_vm5 = vmor %vm678_vm11, %vm936_vm3  ;;  %vm967_vm6 = vcmp.eq.s32.totalorder %v2976_v18, %v848_v63  ;;  %vm968_vm7 = vcmp.eq.s32.totalorder %v2982_v21, %v848_v63 }
  0xad   : > { %vm3115_vm8 = vmor %vm709_vm0, %vm967_vm6  ;;  %561 = vbcast.lane.b32.xlu1 %v3012_v33, 265  ;;  %v1074_v2 = vpop.permute.xlu0 %1073  ;;  %v3191_v33 = vrot.slane %v2858_v17, %v3142_v9 }
  0xae   : > { %vm1032_vm10 = vmor %vm710_vm1, %vm968_vm7  ;;  %vm1257_vm9 = vcmp.eq.s32.totalorder %v2976_v18, %v1074_v2  ;;  %vm1258_vm12 = vcmp.eq.s32.totalorder %v2982_v21, %v1074_v2 }
  0xaf   : > { %vm1322_vm14 = vmor %vm1000_vm5, %vm1258_vm12  ;;  %v1170_v3 = vpop.permute.xlu1 %1169  ;;  %787 = vbcast.lane.b32.xlu0 %v3025_v37, 266  ;;  %v3204_v37 = vrot.slane %v2867_v20, %v3142_v9 }
  0xb0   : > { %vm1289_vm11 = vcmp.eq.s32.totalorder %v2976_v18, %v1170_v3  ;;  %vm1290_vm15 = vcmp.eq.s32.totalorder %v2982_v21, %v1170_v3  ;;  %vm1321_vm0 = vmor %vm3108_vm4, %vm1257_vm9 }
  0xb1   : > { %vm3127_vm2 = vmor %vm1032_vm10, %vm1290_vm15  ;;  %883 = vbcast.lane.b32.xlu1 %v3036_v41, 266  ;;  %v1396_v5 = vpop.permute.xlu0 %1395  ;;  %v3217_v41 = vrot.slane %v2880_v24, %v3142_v9 }
  0xb2   : > { %vm1579_vm1 = vcmp.eq.s32.totalorder %v2976_v18, %v1396_v5  ;;  %vm1580_vm3 = vcmp.eq.s32.totalorder %v2982_v21, %v1396_v5  ;;  %vm3136_vm5 = vmor %vm3115_vm8, %vm1289_vm11 }
  0xb3   : > { %v1492_v8 = vpop.permute.xlu1 %1491  ;;  %1109 = vbcast.lane.b32.xlu0 %v3043_v43, 267  ;;  %vm1644_vm4 = vmor %vm1322_vm14, %vm1580_vm3 }
  0xb4   : > { %vm1611_vm6 = vcmp.eq.s32.totalorder %v2976_v18, %v1492_v8  ;;  %vm1612_vm7 = vcmp.eq.s32.totalorder %v2982_v21, %v1492_v8  ;;  %v2483_v10 = vsel %vm1644_vm4, 1.0, %v2743_v51  ;;  %vm1643_vm10 = vmor %vm1321_vm0, %vm1579_vm1 }
  0xb5   : > { %1205 = vbcast.lane.b32.xlu1 %v3056_v46, 267  ;;  %2545 = vmatprep.mubr.msk.f32.mxu0 %vm4290_vm13, %v2483_v10  ;;  %v194_v11 = vpop.permute.xlu0 %193  ;;  %v2482_v14 = vsel %vm1643_vm10, 1.0, %v2743_v51  ;;  %vm1676_vm8 = vmor %vm3127_vm2, %vm1612_vm7  ;;  %v3329_v10 = vsub.s32 5, %v2831_v7 }
  0xb6   : > { %2020 = vmatmul.mubr.f32.gmra.mrb[2].mxu0 %v2482_v14  ;;  %v2515_v15 = vsel %vm1676_vm8, 1.0, %v2743_v51  ;;  %vm1675_vm9 = vmor %vm3136_vm5, %vm1611_vm6  ;;  %vm357_vm12 = vcmp.eq.s32.totalorder %v2976_v18, %v194_v11  ;;  %vm358_vm15 = vcmp.eq.s32.totalorder %v2982_v21, %v194_v11 }
  0xb7   : > { %v282_v19 = vpop.permute.xlu1 %281  ;;  %1431 = vbcast.lane.b32.xlu0 %v3073_v50, 268  ;;  %2561 = vmatprep.mubr.msk.f32.mxu1 %vm4290_vm13, %v2515_v15  ;;  %v2514_v22 = vsel %vm1675_vm9, 1.0, %v2743_v51  ;;  %v3352_v26 = vrot.slane %v2851_v13, %v3329_v10 }
  0xb8   : > { %2100 = vmatmul.mubr.f32.gmra.mrb[2].mxu1 %v2514_v22  ;;  %vm389_vm2 = vcmp.eq.s32.totalorder %v2976_v18, %v282_v19  ;;  %vm390_vm4 = vcmp.eq.s32.totalorder %v2982_v21, %v282_v19 }
  0xb9   : > { %1527 = vbcast.lane.b32.xlu1 %v3087_v55, 268  ;;  %v438_v25 = vpop.permute.xlu0 %437 }
  0xba   : > { %vm615_vm14 = vcmp.eq.s32.totalorder %v2976_v18, %v438_v25  ;;  %vm616_vm11 = vcmp.eq.s32.totalorder %v2982_v21, %v438_v25  ;;  %v3347_v25 = vrot.slane %v2848_v12, %v3329_v10 }
  0xbb   : > { %vm3171_vm0 = vmor %vm357_vm12, %vm615_vm14  ;;  %v534_v28 = vpop.permute.xlu1 %533  ;;  %226 = vbcast.lane.b32.xlu0 %v3160_v23, 256 }
  0xbc   : > { %vm3181_vm1 = vmor %vm358_vm15, %vm616_vm11  ;;  %vm647_vm3 = vcmp.eq.s32.totalorder %v2976_v18, %v534_v28  ;;  %vm648_vm5 = vcmp.eq.s32.totalorder %v2982_v21, %v534_v28 }
  0xbd   : > { %vm711_vm6 = vmor %vm389_vm2, %vm647_vm3  ;;  %314 = vbcast.lane.b32.xlu1 %v3165_v0, 256  ;;  %v760_v32 = vpop.permute.xlu0 %759 }
  0xbe   : > { %vm712_vm7 = vmor %vm390_vm4, %vm648_vm5  ;;  %vm937_vm10 = vcmp.eq.s32.totalorder %v2976_v18, %v760_v32  ;;  %vm938_vm8 = vcmp.eq.s32.totalorder %v2982_v21, %v760_v32  ;;  %v3378_v32 = vrot.slane %v2858_v17, %v3329_v10 }
  0xbf   : > { %vm3197_vm9 = vmor %vm3171_vm0, %vm937_vm10  ;;  %v856_v36 = vpop.permute.xlu1 %855  ;;  %473 = vbcast.lane.b32.xlu0 %v3178_v29, 257 }
  0xc0   : > { %vm1002_vm12 = vmor %vm3181_vm1, %vm938_vm8  ;;  %vm969_vm14 = vcmp.eq.s32.totalorder %v2976_v18, %v856_v36  ;;  %vm970_vm11 = vcmp.eq.s32.totalorder %v2982_v21, %v856_v36  ;;  %v3391_v36 = vrot.slane %v2867_v20, %v3329_v10 }
  0xc1   : > { %vm3210_vm15 = vmor %vm711_vm6, %vm969_vm14  ;;  %569 = vbcast.lane.b32.xlu1 %v3191_v33, 257  ;;  %v1082_v40 = vpop.permute.xlu0 %1081 }
  0xc2   : > { %vm1034_vm0 = vmor %vm712_vm7, %vm970_vm11  ;;  %vm1259_vm2 = vcmp.eq.s32.totalorder %v2976_v18, %v1082_v40  ;;  %vm1260_vm1 = vcmp.eq.s32.totalorder %v2982_v21, %v1082_v40  ;;  %v3404_v40 = vrot.slane %v2880_v24, %v3329_v10 }
  0xc3   : > { %vm3221_vm3 = vmor %vm1002_vm12, %vm1260_vm1  ;;  %v1178_v43 = vpop.permute.xlu1 %1177  ;;  %795 = vbcast.lane.b32.xlu0 %v3204_v37, 258 }
  0xc4   : > { %vm1291_vm5 = vcmp.eq.s32.totalorder %v2976_v18, %v1178_v43  ;;  %vm1292_vm4 = vcmp.eq.s32.totalorder %v2982_v21, %v1178_v43  ;;  %vm3234_vm6 = vmor %vm3197_vm9, %vm1259_vm2  ;;  %v3415_v43 = vrot.slane %v2884_v27, %v3329_v10 }
  0xc5   : > { %vm3238_vm7 = vmor %vm1034_vm0, %vm1292_vm4  ;;  %891 = vbcast.lane.b32.xlu1 %v3217_v41, 258  ;;  %v1404_v47 = vpop.permute.xlu0 %1403 }
  0xc6   : > { %vm1581_vm10 = vcmp.eq.s32.totalorder %v2976_v18, %v1404_v47  ;;  %vm1582_vm8 = vcmp.eq.s32.totalorder %v2982_v21, %v1404_v47  ;;  %vm3251_vm9 = vmor %vm3210_vm15, %vm1291_vm5  ;;  %v3432_v47 = vrot.slane %v2896_v31, %v3329_v10 }
  0xc7   : > { %v1500_v50 = vpop.permute.xlu1 %1499  ;;  %1117 = vbcast.lane.b32.xlu0 %v3228_v44, 259  ;;  %vm1646_vm12 = vmor %vm3221_vm3, %vm1582_vm8 }
  0xc8   : > { %vm1613_vm14 = vcmp.eq.s32.totalorder %v2976_v18, %v1500_v50  ;;  %vm1614_vm11 = vcmp.eq.s32.totalorder %v2982_v21, %v1500_v50  ;;  %v2485_v53 = vsel %vm1646_vm12, 1.0, %v2743_v51  ;;  %vm1645_vm15 = vmor %vm3234_vm6, %vm1581_vm10  ;;  %v3447_v50 = vrot.slane %v2901_v34, %v3329_v10 }
  0xc9   : > { %1213 = vbcast.lane.b32.xlu1 %v3245_v48, 259  ;;  %2546 = vmatprep.mubr.msk.f32.mxu0 %vm4290_vm13, %v2485_v53  ;;  %v198_v54 = vpop.permute.xlu0 %197  ;;  %v2484_v55 = vsel %vm1645_vm15, 1.0, %v2743_v51  ;;  %vm1678_vm0 = vmor %vm3238_vm7, %vm1614_vm11 }
  0xca   : > { %2025 = vmatmul.mubr.f32.gmra.mrb[4].mxu0 %v2484_v55  ;;  %v2517_v57 = vsel %vm1678_vm0, 1.0, %v2743_v51  ;;  %vm1677_vm2 = vmor %vm3251_vm9, %vm1613_vm14  ;;  %vm359_vm1 = vcmp.eq.s32.totalorder %v2976_v18, %v198_v54  ;;  %vm360_vm4 = vcmp.eq.s32.totalorder %v2982_v21, %v198_v54  ;;  %v3461_v55 = vrot.slane %v2913_v38, %v3329_v10 }
  0xcb   : > { %v286_v58 = vpop.permute.xlu1 %285  ;;  %1439 = vbcast.lane.b32.xlu0 %v3260_v52, 260  ;;  %2562 = vmatprep.mubr.msk.f32.mxu1 %vm4290_vm13, %v2517_v57  ;;  %v2516_v59 = vsel %vm1677_vm2, 1.0, %v2743_v51 }
  0xcc   : > { %2105 = vmatmul.mubr.f32.gmra.mrb[4].mxu1 %v2516_v59  ;;  %vm391_vm7 = vcmp.eq.s32.totalorder %v2976_v18, %v286_v58  ;;  %vm392_vm12 = vcmp.eq.s32.totalorder %v2982_v21, %v286_v58 }
  0xcd   : > { %1535 = vbcast.lane.b32.xlu1 %v3274_v56, 260  ;;  %v442_v60 = vpop.permute.xlu0 %441 }
  0xce   : > { %vm617_vm3 = vcmp.eq.s32.totalorder %v2976_v18, %v442_v60  ;;  %vm618_vm5 = vcmp.eq.s32.totalorder %v2982_v21, %v442_v60 }
  0xcf   : > { %vm681_vm6 = vmor %vm359_vm1, %vm617_vm3  ;;  %v538_v61 = vpop.permute.xlu1 %537  ;;  %230 = vbcast.lane.b32.xlu0 %v3160_v23, 264 }
  0xd0   : > { %vm682_vm10 = vmor %vm360_vm4, %vm618_vm5  ;;  %vm649_vm8 = vcmp.eq.s32.totalorder %v2976_v18, %v538_v61  ;;  %vm650_vm9 = vcmp.eq.s32.totalorder %v2982_v21, %v538_v61 }
  0xd1   : > { %vm713_vm14 = vmor %vm391_vm7, %vm649_vm8  ;;  %318 = vbcast.lane.b32.xlu1 %v3165_v0, 264  ;;  %v764_v62 = vpop.permute.xlu0 %763 }
  0xd2   : > { %vm714_vm11 = vmor %vm392_vm12, %vm650_vm9  ;;  %vm939_vm15 = vcmp.eq.s32.totalorder %v2976_v18, %v764_v62  ;;  %vm940_vm0 = vcmp.eq.s32.totalorder %v2982_v21, %v764_v62 }
  0xd3   : > { %vm3295_vm2 = vmor %vm681_vm6, %vm939_vm15  ;;  %v860_v1 = vpop.permute.xlu1 %859  ;;  %477 = vbcast.lane.b32.xlu0 %v3178_v29, 265  ;;  %v3365_v29 = vrot.slane %v2855_v16, %v3329_v10 }
  0xd4   : > { %vm1004_vm1 = vmor %vm682_vm10, %vm940_vm0  ;;  %vm971_vm3 = vcmp.eq.s32.totalorder %v2976_v18, %v860_v1  ;;  %vm972_vm5 = vcmp.eq.s32.totalorder %v2982_v21, %v860_v1 }
  0xd5   : > { %vm3302_vm4 = vmor %vm713_vm14, %vm971_vm3  ;;  %573 = vbcast.lane.b32.xlu1 %v3191_v33, 265  ;;  %v1086_v3 = vpop.permute.xlu0 %1085 }
  0xd6   : > { %vm1036_vm7 = vmor %vm714_vm11, %vm972_vm5  ;;  %vm1261_vm6 = vcmp.eq.s32.totalorder %v2976_v18, %v1086_v3  ;;  %vm1262_vm8 = vcmp.eq.s32.totalorder %v2982_v21, %v1086_v3 }
  0xd7   : > { %vm1326_vm9 = vmor %vm1004_vm1, %vm1262_vm8  ;;  %v1182_v4 = vpop.permute.xlu1 %1181  ;;  %799 = vbcast.lane.b32.xlu0 %v3204_v37, 266 }
  0xd8   : > { %vm1293_vm10 = vcmp.eq.s32.totalorder %v2976_v18, %v1182_v4  ;;  %vm1294_vm12 = vcmp.eq.s32.totalorder %v2982_v21, %v1182_v4  ;;  %vm1325_vm14 = vmor %vm3295_vm2, %vm1261_vm6 }
  0xd9   : > { %vm3314_vm15 = vmor %vm1036_vm7, %vm1294_vm12  ;;  %895 = vbcast.lane.b32.xlu1 %v3217_v41, 266  ;;  %v1408_v6 = vpop.permute.xlu0 %1407 }
  0xda   : > { %vm1583_vm11 = vcmp.eq.s32.totalorder %v2976_v18, %v1408_v6  ;;  %vm1584_vm0 = vcmp.eq.s32.totalorder %v2982_v21, %v1408_v6  ;;  %vm3323_vm1 = vmor %vm3302_vm4, %vm1293_vm10 }
  0xdb   : > { %v1504_v9 = vpop.permute.xlu1 %1503  ;;  %1121 = vbcast.lane.b32.xlu0 %v3228_v44, 267  ;;  %vm1648_vm2 = vmor %vm1326_vm9, %vm1584_vm0 }
  0xdc   : > { %vm1615_vm3 = vcmp.eq.s32.totalorder %v2976_v18, %v1504_v9  ;;  %vm1616_vm5 = vcmp.eq.s32.totalorder %v2982_v21, %v1504_v9  ;;  %v2487_v11 = vsel %vm1648_vm2, 1.0, %v2743_v51  ;;  %vm1647_vm7 = vmor %vm1325_vm14, %vm1583_vm11  ;;  %v3516_v9 = vsub.s32 6, %v2831_v7 }
  0xdd   : > { %1217 = vbcast.lane.b32.xlu1 %v3245_v48, 267  ;;  %2547 = vmatprep.mubr.msk.f32.mxu0 %vm4290_vm13, %v2487_v11  ;;  %v205_v14 = vpop.permute.xlu0 %204  ;;  %v2486_v15 = vsel %vm1647_vm7, 1.0, %v2743_v51  ;;  %vm1680_vm4 = vmor %vm3314_vm15, %vm1616_vm5 }
  0xde   : > { %2030 = vmatmul.mubr.f32.gmra.mrb[6].mxu0 %v2486_v15  ;;  %v2519_v19 = vsel %vm1680_vm4, 1.0, %v2743_v51  ;;  %vm1679_vm6 = vmor %vm3323_vm1, %vm1615_vm3  ;;  %vm361_vm8 = vcmp.eq.s32.totalorder %v2976_v18, %v205_v14  ;;  %vm362_vm12 = vcmp.eq.s32.totalorder %v2982_v21, %v205_v14  ;;  %v3558_v13 = vrot.slane %v2855_v16, %v3516_v9 }
  0xdf   : > { %v293_v22 = vpop.permute.xlu1 %292  ;;  %1443 = vbcast.lane.b32.xlu0 %v3260_v52, 268  ;;  %2563 = vmatprep.mubr.msk.f32.mxu1 %vm4290_vm13, %v2519_v19  ;;  %v2518_v23 = vsel %vm1679_vm6, 1.0, %v2743_v51  ;;  %v3571_v33 = vrot.slane %v2858_v17, %v3516_v9  ;;  %v3611_v45 = vrot.slane %v2896_v31, %v3516_v9 }
  0xe0   : > { %2110 = vmatmul.mubr.f32.gmra.mrb[6].mxu1 %v2518_v23  ;;  %vm393_vm15 = vcmp.eq.s32.totalorder %v2976_v18, %v293_v22  ;;  %vm394_vm2 = vcmp.eq.s32.totalorder %v2982_v21, %v293_v22  ;;  %v3533_v23 = vld [vmem:[%s2845_s19] sm:$0xff] }
  0xe1   : > { %1539 = vbcast.lane.b32.xlu1 %v3274_v56, 268  ;;  %v450_v0 = vpop.permute.xlu0 %449 }
  0xe2   : > { %vm619_vm9 = vcmp.eq.s32.totalorder %v2976_v18, %v450_v0  ;;  %vm620_vm10 = vcmp.eq.s32.totalorder %v2982_v21, %v450_v0 }
  0xe3   : > { %vm3358_vm14 = vmor %vm361_vm8, %vm619_vm9  ;;  %v546_v12 = vpop.permute.xlu1 %545  ;;  %237 = vbcast.lane.b32.xlu0 %v3347_v25, 256 }
  0xe4   : > { %vm3368_vm11 = vmor %vm362_vm12, %vm620_vm10  ;;  %vm651_vm0 = vcmp.eq.s32.totalorder %v2976_v18, %v546_v12  ;;  %vm652_vm1 = vcmp.eq.s32.totalorder %v2982_v21, %v546_v12 }
  0xe5   : > { %vm715_vm3 = vmor %vm393_vm15, %vm651_vm0  ;;  %325 = vbcast.lane.b32.xlu1 %v3352_v26, 256  ;;  %v772_v30 = vpop.permute.xlu0 %771 }
  0xe6   : > { %vm716_vm5 = vmor %vm394_vm2, %vm652_vm1  ;;  %vm941_vm7 = vcmp.eq.s32.totalorder %v2976_v18, %v772_v30  ;;  %vm942_vm4 = vcmp.eq.s32.totalorder %v2982_v21, %v772_v30 }
  0xe7   : > { %vm3384_vm6 = vmor %vm3358_vm14, %vm941_vm7  ;;  %v868_v35 = vpop.permute.xlu1 %867  ;;  %485 = vbcast.lane.b32.xlu0 %v3365_v29, 257 }
  0xe8   : > { %vm1006_vm8 = vmor %vm3368_vm11, %vm942_vm4  ;;  %vm973_vm9 = vcmp.eq.s32.totalorder %v2976_v18, %v868_v35  ;;  %vm974_vm10 = vcmp.eq.s32.totalorder %v2982_v21, %v868_v35 }
  0xe9   : > { %vm3397_vm12 = vmor %vm715_vm3, %vm973_vm9  ;;  %581 = vbcast.lane.b32.xlu1 %v3378_v32, 257  ;;  %v1094_v39 = vpop.permute.xlu0 %1093 }
  0xea   : > { %vm1038_vm14 = vmor %vm716_vm5, %vm974_vm10  ;;  %vm1263_vm15 = vcmp.eq.s32.totalorder %v2976_v18, %v1094_v39  ;;  %vm1264_vm11 = vcmp.eq.s32.totalorder %v2982_v21, %v1094_v39  ;;  %v3589_v39 = vrot.slane %v2880_v24, %v3516_v9 }
  0xeb   : > { %vm3408_vm0 = vmor %vm1006_vm8, %vm1264_vm11  ;;  %v1190_v42 = vpop.permute.xlu1 %1189  ;;  %807 = vbcast.lane.b32.xlu0 %v3391_v36, 258 }
  0xec   : > { %vm1295_vm1 = vcmp.eq.s32.totalorder %v2976_v18, %v1190_v42  ;;  %vm1296_vm2 = vcmp.eq.s32.totalorder %v2982_v21, %v1190_v42  ;;  %vm3421_vm3 = vmor %vm3384_vm6, %vm1263_vm15  ;;  %v3600_v42 = vrot.slane %v2884_v27, %v3516_v9 }
  0xed   : > { %vm3425_vm5 = vmor %vm1038_vm14, %vm1296_vm2  ;;  %903 = vbcast.lane.b32.xlu1 %v3404_v40, 258  ;;  %v1416_v46 = vpop.permute.xlu0 %1415 }
  0xee   : > { %vm1585_vm7 = vcmp.eq.s32.totalorder %v2976_v18, %v1416_v46  ;;  %vm1586_vm4 = vcmp.eq.s32.totalorder %v2982_v21, %v1416_v46  ;;  %vm3438_vm6 = vmor %vm3397_vm12, %vm1295_vm1 }
  0xef   : > { %v1512_v49 = vpop.permute.xlu1 %1511  ;;  %1129 = vbcast.lane.b32.xlu0 %v3415_v43, 259  ;;  %vm1650_vm8 = vmor %vm3408_vm0, %vm1586_vm4 }
  0xf0   : > { %vm1617_vm9 = vcmp.eq.s32.totalorder %v2976_v18, %v1512_v49  ;;  %vm1618_vm10 = vcmp.eq.s32.totalorder %v2982_v21, %v1512_v49  ;;  %v2489_v52 = vsel %vm1650_vm8, 1.0, %v2743_v51  ;;  %vm1649_vm12 = vmor %vm3421_vm3, %vm1585_vm7 }
  0xf1   : > { %1225 = vbcast.lane.b32.xlu1 %v3432_v47, 259  ;;  %2548 = vmatprep.mubr.msk.f32.mxu0 %vm4290_vm13, %v2489_v52  ;;  %v209_v53 = vpop.permute.xlu0 %208  ;;  %v2488_v54 = vsel %vm1649_vm12, 1.0, %v2743_v51  ;;  %vm1682_vm14 = vmor %vm3425_vm5, %vm1618_vm10  ;;  %v3630_v52 = vrot.slane %v2913_v38, %v3516_v9 }
  0xf2   : > { %2035 = vmatmul.mubr.f32.gmra.mrb[8].mxu0 %v2488_v54  ;;  %v2521_v56 = vsel %vm1682_vm14, 1.0, %v2743_v51  ;;  %vm1681_vm15 = vmor %vm3438_vm6, %vm1617_vm9  ;;  %vm363_vm11 = vcmp.eq.s32.totalorder %v2976_v18, %v209_v53  ;;  %vm364_vm2 = vcmp.eq.s32.totalorder %v2982_v21, %v209_v53 }
  0xf3   : > { %v297_v57 = vpop.permute.xlu1 %296  ;;  %2564 = vmatprep.mubr.msk.f32.mxu1 %vm4290_vm13, %v2521_v56  ;;  %1451 = vbcast.lane.b32.xlu0 %v3447_v50, 260  ;;  %v2520_v58 = vsel %vm1681_vm15, 1.0, %v2743_v51 }
  0xf4   : > { %2115 = vmatmul.mubr.f32.gmra.mrb[8].mxu1 %v2520_v58  ;;  %vm395_vm5 = vcmp.eq.s32.totalorder %v2976_v18, %v297_v57  ;;  %vm396_vm8 = vcmp.eq.s32.totalorder %v2982_v21, %v297_v57 }
  0xf5   : > { %1547 = vbcast.lane.b32.xlu1 %v3461_v55, 260  ;;  %v454_v59 = vpop.permute.xlu0 %453 }
  0xf6   : > { %vm621_vm0 = vcmp.eq.s32.totalorder %v2976_v18, %v454_v59  ;;  %vm622_vm1 = vcmp.eq.s32.totalorder %v2982_v21, %v454_v59 }
  0xf7   : > { %vm685_vm3 = vmor %vm363_vm11, %vm621_vm0  ;;  %v550_v60 = vpop.permute.xlu1 %549  ;;  %241 = vbcast.lane.b32.xlu0 %v3347_v25, 264  ;;  %v3537_v25 = vrot.slane %v3533_v23, %v3516_v9 }
  0xf8   : > { %vm686_vm7 = vmor %vm364_vm2, %vm622_vm1  ;;  %vm653_vm4 = vcmp.eq.s32.totalorder %v2976_v18, %v550_v60  ;;  %vm654_vm6 = vcmp.eq.s32.totalorder %v2982_v21, %v550_v60 }
  0xf9   : > { %vm717_vm9 = vmor %vm395_vm5, %vm653_vm4  ;;  %329 = vbcast.lane.b32.xlu1 %v3352_v26, 264  ;;  %v776_v61 = vpop.permute.xlu0 %775  ;;  %v3541_v26 = vld [vmem:[%s2845_s19 + $0x8] sm:$0xff] }
  0xfa   : > { %vm718_vm10 = vmor %vm396_vm8, %vm654_vm6  ;;  %vm943_vm12 = vcmp.eq.s32.totalorder %v2976_v18, %v776_v61  ;;  %vm944_vm14 = vcmp.eq.s32.totalorder %v2982_v21, %v776_v61  ;;  %v3545_v28 = vrot.slane %v3541_v26, %v3516_v9 }
  0xfb   : > { %vm3482_vm15 = vmor %vm685_vm3, %vm943_vm12  ;;  %v872_v63 = vpop.permute.xlu1 %871  ;;  %489 = vbcast.lane.b32.xlu0 %v3365_v29, 265 }
  0xfc   : > { %vm1008_vm11 = vmor %vm686_vm7, %vm944_vm14  ;;  %vm975_vm0 = vcmp.eq.s32.totalorder %v2976_v18, %v872_v63  ;;  %vm976_vm1 = vcmp.eq.s32.totalorder %v2982_v21, %v872_v63 }
  0xfd   : > { %vm3489_vm2 = vmor %vm717_vm9, %vm975_vm0  ;;  %585 = vbcast.lane.b32.xlu1 %v3378_v32, 265  ;;  %v1098_v2 = vpop.permute.xlu0 %1097 }
  0xfe   : > { %vm1040_vm5 = vmor %vm718_vm10, %vm976_vm1  ;;  %vm1265_vm3 = vcmp.eq.s32.totalorder %v2976_v18, %v1098_v2  ;;  %vm1266_vm4 = vcmp.eq.s32.totalorder %v2982_v21, %v1098_v2 }
  0xff   : > { %vm1330_vm6 = vmor %vm1008_vm11, %vm1266_vm4  ;;  %v1194_v3 = vpop.permute.xlu1 %1193  ;;  %811 = vbcast.lane.b32.xlu0 %v3391_v36, 266  ;;  %v3580_v36 = vrot.slane %v2867_v20, %v3516_v9 }
 0x100   : > { %vm1297_vm7 = vcmp.eq.s32.totalorder %v2976_v18, %v1194_v3  ;;  %vm1298_vm8 = vcmp.eq.s32.totalorder %v2982_v21, %v1194_v3  ;;  %vm1329_vm9 = vmor %vm3482_vm15, %vm1265_vm3  ;;  %v3673_v3 = vsub.s32 7, %v2831_v7 }
 0x101   : > { %vm3501_vm12 = vmor %vm1040_vm5, %vm1298_vm8  ;;  %907 = vbcast.lane.b32.xlu1 %v3404_v40, 266  ;;  %v1420_v5 = vpop.permute.xlu0 %1419 }
 0x102   : > { %vm1587_vm10 = vcmp.eq.s32.totalorder %v2976_v18, %v1420_v5  ;;  %vm1588_vm14 = vcmp.eq.s32.totalorder %v2982_v21, %v1420_v5  ;;  %vm3510_vm11 = vmor %vm3489_vm2, %vm1297_vm7  ;;  %v3762_v30 = vrot.slane %v2896_v31, %v3673_v3 }
 0x103   : > { %v1516_v8 = vpop.permute.xlu1 %1515  ;;  %1133 = vbcast.lane.b32.xlu0 %v3415_v43, 267  ;;  %vm1652_vm15 = vmor %vm1330_vm6, %vm1588_vm14 }
 0x104   : > { %vm1619_vm0 = vcmp.eq.s32.totalorder %v2976_v18, %v1516_v8  ;;  %vm1620_vm1 = vcmp.eq.s32.totalorder %v2982_v21, %v1516_v8  ;;  %v2491_v10 = vsel %vm1652_vm15, 1.0, %v2743_v51  ;;  %vm1651_vm5 = vmor %vm1329_vm9, %vm1587_vm10 }
 0x105   : > { %1229 = vbcast.lane.b32.xlu1 %v3432_v47, 267  ;;  %2549 = vmatprep.mubr.msk.f32.mxu0 %vm4290_vm13, %v2491_v10  ;;  %v216_v11 = vpop.permute.xlu0 %215  ;;  %v2490_v14 = vsel %vm1651_vm5, 1.0, %v2743_v51  ;;  %vm1684_vm2 = vmor %vm3501_vm12, %vm1620_vm1  ;;  %v3618_v47 = vrot.slane %v2901_v34, %v3516_v9  ;;  %v3691_v10 = vrot.slane %v3533_v23, %v3673_v3 }
 0x106   : > { %2040 = vmatmul.mubr.f32.gmra.mrb[10].mxu0 %v2490_v14  ;;  %v2523_v15 = vsel %vm1684_vm2, 1.0, %v2743_v51  ;;  %vm1683_vm3 = vmor %vm3510_vm11, %vm1619_vm0  ;;  %vm365_vm4 = vcmp.eq.s32.totalorder %v2976_v18, %v216_v11  ;;  %vm366_vm8 = vcmp.eq.s32.totalorder %v2982_v21, %v216_v11  ;;  %v3696_v14 = vrot.slane %v3541_v26, %v3673_v3 }
 0x107   : > { %v304_v19 = vpop.permute.xlu1 %303  ;;  %2565 = vmatprep.mubr.msk.f32.mxu1 %vm4290_vm13, %v2523_v15  ;;  %1455 = vbcast.lane.b32.xlu0 %v3447_v50, 268  ;;  %v2522_v22 = vsel %vm1683_vm3, 1.0, %v2743_v51  ;;  %v3731_v26 = vrot.slane %v2867_v20, %v3673_v3 }
 0x108   : > { %2120 = vmatmul.mubr.f32.gmra.mrb[10].mxu1 %v2522_v22  ;;  %vm397_vm12 = vcmp.eq.s32.totalorder %v2976_v18, %v304_v19  ;;  %vm398_vm15 = vcmp.eq.s32.totalorder %v2982_v21, %v304_v19  ;;  %v3709_v22 = vrot.slane %v2855_v16, %v3673_v3  ;;  %v3722_v16 = vrot.slane %v2858_v17, %v3673_v3 }
 0x109   : > { %1551 = vbcast.lane.b32.xlu1 %v3461_v55, 268  ;;  %v462_v0 = vpop.permute.xlu0 %461 }
 0x10a   : > { %vm623_vm6 = vcmp.eq.s32.totalorder %v2976_v18, %v462_v0  ;;  %vm624_vm7 = vcmp.eq.s32.totalorder %v2982_v21, %v462_v0 }
 0x10b   : > { %vm3551_vm9 = vmor %vm365_vm4, %vm623_vm6  ;;  %v558_v29 = vpop.permute.xlu1 %557  ;;  %248 = vbcast.lane.b32.xlu0 %v3537_v25, 256 }
 0x10c   : > { %vm3561_vm10 = vmor %vm366_vm8, %vm624_vm7  ;;  %vm655_vm14 = vcmp.eq.s32.totalorder %v2976_v18, %v558_v29  ;;  %vm656_vm11 = vcmp.eq.s32.totalorder %v2982_v21, %v558_v29  ;;  %v3751_v29 = vrot.slane %v2884_v27, %v3673_v3 }
 0x10d   : > { %vm719_vm0 = vmor %vm397_vm12, %vm655_vm14  ;;  %336 = vbcast.lane.b32.xlu1 %v3545_v28, 256  ;;  %v784_v32 = vpop.permute.xlu0 %783 }
 0x10e   : > { %vm720_vm1 = vmor %vm398_vm15, %vm656_vm11  ;;  %vm945_vm5 = vcmp.eq.s32.totalorder %v2976_v18, %v784_v32  ;;  %vm946_vm2 = vcmp.eq.s32.totalorder %v2982_v21, %v784_v32  ;;  %v3769_v32 = vrot.slane %v2901_v34, %v3673_v3  ;;  %v3781_v34 = vrot.slane %v2913_v38, %v3673_v3 }
 0x10f   : > { %vm1009_vm3 = vmor %vm3551_vm9, %vm945_vm5  ;;  %v880_v35 = vpop.permute.xlu1 %879  ;;  %497 = vbcast.lane.b32.xlu0 %v3558_v13, 257 }
 0x110   : > { %vm1010_vm4 = vmor %vm3561_vm10, %vm946_vm2  ;;  %vm977_vm6 = vcmp.eq.s32.totalorder %v2976_v18, %v880_v35  ;;  %vm978_vm7 = vcmp.eq.s32.totalorder %v2982_v21, %v880_v35 }
 0x111   : > { %vm1041_vm8 = vmor %vm719_vm0, %vm977_vm6  ;;  %593 = vbcast.lane.b32.xlu1 %v3571_v33, 257  ;;  %v1106_v37 = vpop.permute.xlu0 %1105 }
 0x112   : > { %vm1042_vm9 = vmor %vm720_vm1, %vm978_vm7  ;;  %vm1267_vm12 = vcmp.eq.s32.totalorder %v2976_v18, %v1106_v37  ;;  %vm1268_vm14 = vcmp.eq.s32.totalorder %v2982_v21, %v1106_v37 }
 0x113   : > { %vm3593_vm11 = vmor %vm1009_vm3, %vm1267_vm12  ;;  %v1202_v41 = vpop.permute.xlu1 %1201  ;;  %819 = vbcast.lane.b32.xlu0 %v3580_v36, 258 }
 0x114   : > { %vm1332_vm10 = vmor %vm1010_vm4, %vm1268_vm14  ;;  %vm1299_vm15 = vcmp.eq.s32.totalorder %v2976_v18, %v1202_v41  ;;  %vm1300_vm0 = vcmp.eq.s32.totalorder %v2982_v21, %v1202_v41 }
 0x115   : > { %vm3604_vm1 = vmor %vm1041_vm8, %vm1299_vm15  ;;  %915 = vbcast.lane.b32.xlu1 %v3589_v39, 258  ;;  %v1428_v44 = vpop.permute.xlu0 %1427 }
 0x116   : > { %vm1364_vm5 = vmor %vm1042_vm9, %vm1300_vm0  ;;  %vm1589_vm2 = vcmp.eq.s32.totalorder %v2976_v18, %v1428_v44  ;;  %vm1590_vm3 = vcmp.eq.s32.totalorder %v2982_v21, %v1428_v44 }
 0x117   : > { %vm1654_vm4 = vmor %vm1332_vm10, %vm1590_vm3  ;;  %v1524_v46 = vpop.permute.xlu1 %1523  ;;  %1141 = vbcast.lane.b32.xlu0 %v3600_v42, 259 }
 0x118   : > { %vm1621_vm6 = vcmp.eq.s32.totalorder %v2976_v18, %v1524_v46  ;;  %vm1622_vm7 = vcmp.eq.s32.totalorder %v2982_v21, %v1524_v46  ;;  %v2493_v48 = vsel %vm1654_vm4, 1.0, %v2743_v51  ;;  %vm1653_vm8 = vmor %vm3593_vm11, %vm1589_vm2 }
 0x119   : > { %vm1686_vm9 = vmor %vm1364_vm5, %vm1622_vm7  ;;  %1237 = vbcast.lane.b32.xlu1 %v3611_v45, 259  ;;  %2550 = vmatprep.mubr.msk.f32.mxu0 %vm4290_vm13, %v2493_v48  ;;  %v220_v49 = vpop.permute.xlu0 %219  ;;  %v2492_v50 = vsel %vm1653_vm8, 1.0, %v2743_v51 }
 0x11a   : > { %2045 = vmatmul.mubr.f32.gmra.mrb[12].mxu0 %v2492_v50  ;;  %v2525_v53 = vsel %vm1686_vm9, 1.0, %v2743_v51  ;;  %vm1685_vm12 = vmor %vm3604_vm1, %vm1621_vm6  ;;  %vm367_vm14 = vcmp.eq.s32.totalorder %v2976_v18, %v220_v49  ;;  %vm368_vm15 = vcmp.eq.s32.totalorder %v2982_v21, %v220_v49 }
 0x11b   : > { %v308_v54 = vpop.permute.xlu1 %307  ;;  %2566 = vmatprep.mubr.msk.f32.mxu1 %vm4290_vm13, %v2525_v53  ;;  %1463 = vbcast.lane.b32.xlu0 %v3618_v47, 260  ;;  %v2524_v55 = vsel %vm1685_vm12, 1.0, %v2743_v51 }
 0x11c   : > { %2125 = vmatmul.mubr.f32.gmra.mrb[12].mxu1 %v2524_v55  ;;  %vm399_vm1 = vcmp.eq.s32.totalorder %v2976_v18, %v308_v54  ;;  %vm400_vm4 = vcmp.eq.s32.totalorder %v2982_v21, %v308_v54 }
 0x11d   : > { %1559 = vbcast.lane.b32.xlu1 %v3630_v52, 260  ;;  %v466_v56 = vpop.permute.xlu0 %465 }
 0x11e   : > { %vm625_vm11 = vcmp.eq.s32.totalorder %v2976_v18, %v466_v56  ;;  %vm626_vm10 = vcmp.eq.s32.totalorder %v2982_v21, %v466_v56 }
 0x11f   : > { %vm689_vm0 = vmor %vm367_vm14, %vm625_vm11  ;;  %v562_v57 = vpop.permute.xlu1 %561  ;;  %252 = vbcast.lane.b32.xlu0 %v3537_v25, 264 }
 0x120   : > { %vm690_vm5 = vmor %vm368_vm15, %vm626_vm10  ;;  %vm657_vm2 = vcmp.eq.s32.totalorder %v2976_v18, %v562_v57  ;;  %vm658_vm3 = vcmp.eq.s32.totalorder %v2982_v21, %v562_v57 }
 0x121   : > { %vm721_vm6 = vmor %vm399_vm1, %vm657_vm2  ;;  %340 = vbcast.lane.b32.xlu1 %v3545_v28, 264  ;;  %v788_v58 = vpop.permute.xlu0 %787  ;;  %v3740_v28 = vrot.slane %v2880_v24, %v3673_v3 }
 0x122   : > { %vm722_vm7 = vmor %vm400_vm4, %vm658_vm3  ;;  %vm947_vm8 = vcmp.eq.s32.totalorder %v2976_v18, %v788_v58  ;;  %vm948_vm9 = vcmp.eq.s32.totalorder %v2982_v21, %v788_v58 }
 0x123   : > { %vm1011_vm12 = vmor %vm689_vm0, %vm947_vm8  ;;  %v884_v59 = vpop.permute.xlu1 %883  ;;  %501 = vbcast.lane.b32.xlu0 %v3558_v13, 265 }
 0x124   : > { %vm1012_vm14 = vmor %vm690_vm5, %vm948_vm9  ;;  %vm979_vm11 = vcmp.eq.s32.totalorder %v2976_v18, %v884_v59  ;;  %vm980_vm10 = vcmp.eq.s32.totalorder %v2982_v21, %v884_v59 }
 0x125   : > { %vm1043_vm15 = vmor %vm721_vm6, %vm979_vm11  ;;  %597 = vbcast.lane.b32.xlu1 %v3571_v33, 265  ;;  %v1110_v60 = vpop.permute.xlu0 %1109 }
 0x126   : > { %vm1044_vm1 = vmor %vm722_vm7, %vm980_vm10  ;;  %vm1269_vm2 = vcmp.eq.s32.totalorder %v2976_v18, %v1110_v60  ;;  %vm1270_vm3 = vcmp.eq.s32.totalorder %v2982_v21, %v1110_v60 }
 0x127   : > { %vm3657_vm4 = vmor %vm1011_vm12, %vm1269_vm2  ;;  %v1206_v62 = vpop.permute.xlu1 %1205  ;;  %823 = vbcast.lane.b32.xlu0 %v3580_v36, 266 }
 0x128   : > { %vm1334_vm0 = vmor %vm1012_vm14, %vm1270_vm3  ;;  %vm1301_vm5 = vcmp.eq.s32.totalorder %v2976_v18, %v1206_v62  ;;  %vm1302_vm6 = vcmp.eq.s32.totalorder %v2982_v21, %v1206_v62 }
 0x129   : > { %vm3664_vm8 = vmor %vm1043_vm15, %vm1301_vm5  ;;  %919 = vbcast.lane.b32.xlu1 %v3589_v39, 266  ;;  %v1432_v1 = vpop.permute.xlu0 %1431 }
 0x12a   : > { %vm1366_vm7 = vmor %vm1044_vm1, %vm1302_vm6  ;;  %vm1591_vm9 = vcmp.eq.s32.totalorder %v2976_v18, %v1432_v1  ;;  %vm1592_vm12 = vcmp.eq.s32.totalorder %v2982_v21, %v1432_v1 }
 0x12b   : > { %vm1656_vm11 = vmor %vm1334_vm0, %vm1592_vm12  ;;  %v1528_v2 = vpop.permute.xlu1 %1527  ;;  %1145 = vbcast.lane.b32.xlu0 %v3600_v42, 267 }
 0x12c   : > { %vm1623_vm14 = vcmp.eq.s32.totalorder %v2976_v18, %v1528_v2  ;;  %vm1624_vm10 = vcmp.eq.s32.totalorder %v2982_v21, %v1528_v2  ;;  %v2495_v4 = vsel %vm1656_vm11, 1.0, %v2743_v51  ;;  %vm1655_vm15 = vmor %vm3657_vm4, %vm1591_vm9 }
 0x12d   : > { %vm1688_vm1 = vmor %vm1366_vm7, %vm1624_vm10  ;;  %1241 = vbcast.lane.b32.xlu1 %v3611_v45, 267  ;;  %2551 = vmatprep.mubr.msk.f32.mxu0 %vm4290_vm13, %v2495_v4  ;;  %v227_v5 = vpop.permute.xlu0 %226  ;;  %v2494_v6 = vsel %vm1655_vm15, 1.0, %v2743_v51 }
 0x12e   : > { %2050 = vmatmul.mubr.f32.gmra.mrb[14].mxu0 %v2494_v6  ;;  %v2527_v7 = vsel %vm1688_vm1, 1.0, %v2743_v51  ;;  %vm1687_vm2 = vmor %vm3664_vm8, %vm1623_vm14  ;;  %vm369_vm3 = vcmp.eq.s32.totalorder %v2976_v18, %v227_v5  ;;  %vm370_vm5 = vcmp.eq.s32.totalorder %v2982_v21, %v227_v5 }
 0x12f   : > { %v315_v8 = vpop.permute.xlu1 %314  ;;  %2567 = vmatprep.mubr.msk.f32.mxu1 %vm4290_vm13, %v2527_v7  ;;  %1467 = vbcast.lane.b32.xlu0 %v3618_v47, 268  ;;  %v2526_v9 = vsel %vm1687_vm2, 1.0, %v2743_v51 }
 0x130   : > { %2130 = vmatmul.mubr.f32.gmra.mrb[14].mxu1 %v2526_v9  ;;  %vm401_vm8 = vcmp.eq.s32.totalorder %v2976_v18, %v315_v8  ;;  %vm402_vm11 = vcmp.eq.s32.totalorder %v2982_v21, %v315_v8 }
 0x131   : > { %1563 = vbcast.lane.b32.xlu1 %v3630_v52, 268  ;;  %v474_v11 = vpop.permute.xlu0 %473 }
 0x132   : > { %vm627_vm4 = vcmp.eq.s32.totalorder %v2976_v18, %v474_v11  ;;  %vm628_vm0 = vcmp.eq.s32.totalorder %v2982_v21, %v474_v11 }
 0x133   : > { %vm3702_vm6 = vmor %vm369_vm3, %vm627_vm4  ;;  %v570_v19 = vpop.permute.xlu1 %569  ;;  %259 = vbcast.lane.b32.xlu0 %v3691_v10, 256 }
 0x134   : > { %vm3712_vm7 = vmor %vm370_vm5, %vm628_vm0  ;;  %vm659_vm9 = vcmp.eq.s32.totalorder %v2976_v18, %v570_v19  ;;  %vm660_vm12 = vcmp.eq.s32.totalorder %v2982_v21, %v570_v19 }
 0x135   : > { %vm723_vm14 = vmor %vm401_vm8, %vm659_vm9  ;;  %347 = vbcast.lane.b32.xlu1 %v3696_v14, 256  ;;  %v796_v25 = vpop.permute.xlu0 %795 }
 0x136   : > { %vm724_vm10 = vmor %vm402_vm11, %vm660_vm12  ;;  %vm949_vm15 = vcmp.eq.s32.totalorder %v2976_v18, %v796_v25  ;;  %vm950_vm1 = vcmp.eq.s32.totalorder %v2982_v21, %v796_v25 }
 0x137   : > { %vm1013_vm2 = vmor %vm3702_vm6, %vm949_vm15  ;;  %v892_v0 = vpop.permute.xlu1 %891  ;;  %509 = vbcast.lane.b32.xlu0 %v3709_v22, 257 }
 0x138   : > { %vm1014_vm3 = vmor %vm3712_vm7, %vm950_vm1  ;;  %vm981_vm4 = vcmp.eq.s32.totalorder %v2976_v18, %v892_v0  ;;  %vm982_vm0 = vcmp.eq.s32.totalorder %v2982_v21, %v892_v0 }
 0x139   : > { %vm1045_vm5 = vmor %vm723_vm14, %vm981_vm4  ;;  %605 = vbcast.lane.b32.xlu1 %v3722_v16, 257  ;;  %v1118_v17 = vpop.permute.xlu0 %1117 }
 0x13a   : > { %vm1046_vm6 = vmor %vm724_vm10, %vm982_vm0  ;;  %vm1271_vm8 = vcmp.eq.s32.totalorder %v2976_v18, %v1118_v17  ;;  %vm1272_vm9 = vcmp.eq.s32.totalorder %v2982_v21, %v1118_v17 }
 0x13b   : > { %vm3744_vm12 = vmor %vm1013_vm2, %vm1271_vm8  ;;  %v1214_v12 = vpop.permute.xlu1 %1213  ;;  %831 = vbcast.lane.b32.xlu0 %v3731_v26, 258 }
 0x13c   : > { %vm1336_vm7 = vmor %vm1014_vm3, %vm1272_vm9  ;;  %vm1303_vm11 = vcmp.eq.s32.totalorder %v2976_v18, %v1214_v12  ;;  %vm1304_vm14 = vcmp.eq.s32.totalorder %v2982_v21, %v1214_v12 }
 0x13d   : > { %vm3755_vm10 = vmor %vm1045_vm5, %vm1303_vm11  ;;  %927 = vbcast.lane.b32.xlu1 %v3740_v28, 258  ;;  %v1440_v13 = vpop.permute.xlu0 %1439 }
 0x13e   : > { %vm1368_vm15 = vmor %vm1046_vm6, %vm1304_vm14  ;;  %vm1593_vm1 = vcmp.eq.s32.totalorder %v2976_v18, %v1440_v13  ;;  %vm1594_vm2 = vcmp.eq.s32.totalorder %v2982_v21, %v1440_v13 }
 0x13f   : > { %vm1658_vm3 = vmor %vm1336_vm7, %vm1594_vm2  ;;  %v1536_v27 = vpop.permute.xlu1 %1535  ;;  %1153 = vbcast.lane.b32.xlu0 %v3751_v29, 259 }
 0x140   : > { %vm1625_vm4 = vcmp.eq.s32.totalorder %v2976_v18, %v1536_v27  ;;  %vm1626_vm0 = vcmp.eq.s32.totalorder %v2982_v21, %v1536_v27  ;;  %v2497_v31 = vsel %vm1658_vm3, 1.0, %v2743_v51  ;;  %vm1657_vm5 = vmor %vm3744_vm12, %vm1593_vm1 }
 0x141   : > { %vm1690_vm6 = vmor %vm1368_vm15, %vm1626_vm0  ;;  %1249 = vbcast.lane.b32.xlu1 %v3762_v30, 259  ;;  %2552 = vmatprep.mubr.msk.f32.mxu0 %vm4290_vm13, %v2497_v31  ;;  %v231_v33 = vpop.permute.xlu0 %230  ;;  %v2496_v35 = vsel %vm1657_vm5, 1.0, %v2743_v51 }
 0x142   : > { %2055 = vmatmul.mubr.f32.gmra.mrb[16].mxu0 %v2496_v35  ;;  %v2529_v36 = vsel %vm1690_vm6, 1.0, %v2743_v51  ;;  %vm1689_vm8 = vmor %vm3755_vm10, %vm1625_vm4  ;;  %vm371_vm9 = vcmp.eq.s32.totalorder %v2976_v18, %v231_v33  ;;  %vm372_vm11 = vcmp.eq.s32.totalorder %v2982_v21, %v231_v33 }
 0x143   : > { %v319_v37 = vpop.permute.xlu1 %318  ;;  %2568 = vmatprep.mubr.msk.f32.mxu1 %vm4290_vm13, %v2529_v36  ;;  %1475 = vbcast.lane.b32.xlu0 %v3769_v32, 260  ;;  %v2528_v39 = vsel %vm1689_vm8, 1.0, %v2743_v51 }
 0x144   : > { %2135 = vmatmul.mubr.f32.gmra.mrb[16].mxu1 %v2528_v39  ;;  %vm403_vm10 = vcmp.eq.s32.totalorder %v2976_v18, %v319_v37  ;;  %vm404_vm3 = vcmp.eq.s32.totalorder %v2982_v21, %v319_v37 }
 0x145   : > { %1571 = vbcast.lane.b32.xlu1 %v3781_v34, 260  ;;  %v478_v40 = vpop.permute.xlu0 %477 }
 0x146   : > { %vm629_vm12 = vcmp.eq.s32.totalorder %v2976_v18, %v478_v40  ;;  %vm630_vm7 = vcmp.eq.s32.totalorder %v2982_v21, %v478_v40 }
 0x147   : > { %vm693_vm14 = vmor %vm371_vm9, %vm629_vm12  ;;  %v574_v38 = vpop.permute.xlu1 %573  ;;  %263 = vbcast.lane.b32.xlu0 %v3691_v10, 264 }
 0x148   : > { %vm694_vm15 = vmor %vm372_vm11, %vm630_vm7  ;;  %vm661_vm1 = vcmp.eq.s32.totalorder %v2976_v18, %v574_v38  ;;  %vm662_vm2 = vcmp.eq.s32.totalorder %v2982_v21, %v574_v38 }
 0x149   : > { %vm725_vm4 = vmor %vm403_vm10, %vm661_vm1  ;;  %351 = vbcast.lane.b32.xlu1 %v3696_v14, 264  ;;  %v800_v41 = vpop.permute.xlu0 %799 }
 0x14a   : > { %vm726_vm0 = vmor %vm404_vm3, %vm662_vm2  ;;  %vm951_vm5 = vcmp.eq.s32.totalorder %v2976_v18, %v800_v41  ;;  %vm952_vm6 = vcmp.eq.s32.totalorder %v2982_v21, %v800_v41 }
 0x14b   : > { %vm1015_vm8 = vmor %vm693_vm14, %vm951_vm5  ;;  %v896_v42 = vpop.permute.xlu1 %895  ;;  %513 = vbcast.lane.b32.xlu0 %v3709_v22, 265 }
 0x14c   : > { %vm1016_vm9 = vmor %vm694_vm15, %vm952_vm6  ;;  %vm983_vm12 = vcmp.eq.s32.totalorder %v2976_v18, %v896_v42  ;;  %vm984_vm7 = vcmp.eq.s32.totalorder %v2982_v21, %v896_v42 }
 0x14d   : > { %vm1047_vm11 = vmor %vm725_vm4, %vm983_vm12  ;;  %609 = vbcast.lane.b32.xlu1 %v3722_v16, 265  ;;  %v1122_v43 = vpop.permute.xlu0 %1121 }
 0x14e   : > { %vm1048_vm10 = vmor %vm726_vm0, %vm984_vm7  ;;  %vm1273_vm1 = vcmp.eq.s32.totalorder %v2976_v18, %v1122_v43  ;;  %vm1274_vm2 = vcmp.eq.s32.totalorder %v2982_v21, %v1122_v43 }
 0x14f   : > { %vm3808_vm3 = vmor %vm1015_vm8, %vm1273_vm1  ;;  %v1218_v45 = vpop.permute.xlu1 %1217  ;;  %835 = vbcast.lane.b32.xlu0 %v3731_v26, 266 }
 0x150   : > { %vm1338_vm14 = vmor %vm1016_vm9, %vm1274_vm2  ;;  %vm1305_vm15 = vcmp.eq.s32.totalorder %v2976_v18, %v1218_v45  ;;  %vm1306_vm4 = vcmp.eq.s32.totalorder %v2982_v21, %v1218_v45 }
 0x151   : > { %vm3815_vm5 = vmor %vm1047_vm11, %vm1305_vm15  ;;  %931 = vbcast.lane.b32.xlu1 %v3740_v28, 266  ;;  %v1444_v47 = vpop.permute.xlu0 %1443 }
 0x152   : > { %vm1370_vm0 = vmor %vm1048_vm10, %vm1306_vm4  ;;  %vm1595_vm6 = vcmp.eq.s32.totalorder %v2976_v18, %v1444_v47  ;;  %vm1596_vm8 = vcmp.eq.s32.totalorder %v2982_v21, %v1444_v47 }
 0x153   : > { %vm1660_vm12 = vmor %vm1338_vm14, %vm1596_vm8  ;;  %v1540_v48 = vpop.permute.xlu1 %1539  ;;  %1157 = vbcast.lane.b32.xlu0 %v3751_v29, 267 }
 0x154   : > { %vm1627_vm9 = vcmp.eq.s32.totalorder %v2976_v18, %v1540_v48  ;;  %vm1628_vm7 = vcmp.eq.s32.totalorder %v2982_v21, %v1540_v48  ;;  %v2499_v49 = vsel %vm1660_vm12, 1.0, %v2743_v51  ;;  %vm1659_vm11 = vmor %vm3808_vm3, %vm1595_vm6 }
 0x155   : > { %vm1692_vm1 = vmor %vm1370_vm0, %vm1628_vm7  ;;  %1253 = vbcast.lane.b32.xlu1 %v3762_v30, 267  ;;  %2553 = vmatprep.mubr.msk.f32.mxu0 %vm4290_vm13, %v2499_v49  ;;  %v238_v50 = vpop.permute.xlu0 %237  ;;  %v2498_v52 = vsel %vm1659_vm11, 1.0, %v2743_v51 }
 0x156   : > { %2060 = vmatmul.mubr.f32.gmra.mrb[18].mxu0 %v2498_v52  ;;  %v2531_v53 = vsel %vm1692_vm1, 1.0, %v2743_v51  ;;  %vm1691_vm10 = vmor %vm3815_vm5, %vm1627_vm9  ;;  %vm373_vm2 = vcmp.eq.s32.totalorder %v2976_v18, %v238_v50  ;;  %vm374_vm15 = vcmp.eq.s32.totalorder %v2982_v21, %v238_v50 }
 0x157   : > { %v326_v54 = vpop.permute.xlu1 %325  ;;  %2569 = vmatprep.mubr.msk.f32.mxu1 %vm4290_vm13, %v2531_v53  ;;  %1479 = vbcast.lane.b32.xlu0 %v3769_v32, 268  ;;  %v2530_v55 = vsel %vm1691_vm10, 1.0, %v2743_v51 }
 0x158   : > { %2140 = vmatmul.mubr.f32.gmra.mrb[18].mxu1 %v2530_v55  ;;  %vm405_vm5 = vcmp.eq.s32.totalorder %v2976_v18, %v326_v54  ;;  %vm406_vm12 = vcmp.eq.s32.totalorder %v2982_v21, %v326_v54 }
 0x159   : > { %1575 = vbcast.lane.b32.xlu1 %v3781_v34, 268  ;;  %v486_v56 = vpop.permute.xlu0 %485 }
 0x15a   : > { %vm631_vm3 = vcmp.eq.s32.totalorder %v2976_v18, %v486_v56  ;;  %vm632_vm14 = vcmp.eq.s32.totalorder %v2982_v21, %v486_v56 }
 0x15b   : > { %vm695_vm4 = vmor %vm373_vm2, %vm631_vm3  ;;  %v582_v57 = vpop.permute.xlu1 %581 }
 0x15c   : > { %vm696_vm0 = vmor %vm374_vm15, %vm632_vm14  ;;  %vm663_vm6 = vcmp.eq.s32.totalorder %v2976_v18, %v582_v57  ;;  %vm664_vm8 = vcmp.eq.s32.totalorder %v2982_v21, %v582_v57 }
 0x15d   : > { %vm727_vm9 = vmor %vm405_vm5, %vm663_vm6  ;;  %v808_v58 = vpop.permute.xlu0 %807 }
 0x15e   : > { %vm728_vm7 = vmor %vm406_vm12, %vm664_vm8  ;;  %vm953_vm11 = vcmp.eq.s32.totalorder %v2976_v18, %v808_v58  ;;  %vm954_vm1 = vcmp.eq.s32.totalorder %v2982_v21, %v808_v58 }
 0x15f   : > { %vm1017_vm10 = vmor %vm695_vm4, %vm953_vm11  ;;  %v904_v59 = vpop.permute.xlu1 %903 }
 0x160   : > { %vm1018_vm2 = vmor %vm696_vm0, %vm954_vm1  ;;  %vm985_vm3 = vcmp.eq.s32.totalorder %v2976_v18, %v904_v59  ;;  %vm986_vm14 = vcmp.eq.s32.totalorder %v2982_v21, %v904_v59 }
 0x161   : > { %vm1049_vm15 = vmor %vm727_vm9, %vm985_vm3  ;;  %v1130_v60 = vpop.permute.xlu0 %1129 }
 0x162   : > { %vm1050_vm13 = vmor %vm728_vm7, %vm986_vm14  ;;  %vm1275_vm5 = vcmp.eq.s32.totalorder %v2976_v18, %v1130_v60  ;;  %vm1276_vm6 = vcmp.eq.s32.totalorder %v2982_v21, %v1130_v60 }
 0x163   : > { %vm3852_vm8 = vmor %vm1017_vm10, %vm1275_vm5  ;;  %v1226_v62 = vpop.permute.xlu1 %1225  ;;  %vm4389_vm5 = vcmask 261120  }
 0x164   : > { %vm1340_vm12 = vmor %vm1018_vm2, %vm1276_vm6  ;;  %vm1307_vm4 = vcmp.eq.s32.totalorder %v2976_v18, %v1226_v62  ;;  %vm1308_vm0 = vcmp.eq.s32.totalorder %v2982_v21, %v1226_v62 }
 0x165   : > { %vm3858_vm11 = vmor %vm1049_vm15, %vm1307_vm4  ;;  %v1452_v1 = vpop.permute.xlu0 %1451 }
 0x166   : > { %vm1372_vm9 = vmor %vm1050_vm13, %vm1308_vm0  ;;  %vm1597_vm7 = vcmp.eq.s32.totalorder %v2976_v18, %v1452_v1  ;;  %vm1598_vm1 = vcmp.eq.s32.totalorder %v2982_v21, %v1452_v1 }
 0x167   : > { %vm1662_vm10 = vmor %vm1340_vm12, %vm1598_vm1  ;;  %v1548_v2 = vpop.permute.xlu1 %1547 }
 0x168   : > { %vm1629_vm3 = vcmp.eq.s32.totalorder %v2976_v18, %v1548_v2  ;;  %vm1630_vm2 = vcmp.eq.s32.totalorder %v2982_v21, %v1548_v2  ;;  %v2501_v3 = vsel %vm1662_vm10, 1.0, %v2743_v51  ;;  %vm1661_vm14 = vmor %vm3852_vm8, %vm1597_vm7 }
 0x169   : > { %vm1694_vm15 = vmor %vm1372_vm9, %vm1630_vm2  ;;  %2554 = vmatprep.mubr.msk.f32.mxu0 %vm4389_vm5, %v2501_v3  ;;  %v242_v4 = vpop.permute.xlu0 %241  ;;  %v2500_v5 = vsel %vm1661_vm14, 1.0, %v2743_v51 }
 0x16a   : > { %2065 = vmatmul.mubr.f32.gmra.mrb[20].mxu0 %v2500_v5  ;;  %v2533_v6 = vsel %vm1694_vm15, 1.0, %v2743_v51  ;;  %vm1693_vm13 = vmor %vm3858_vm11, %vm1629_vm3  ;;  %vm375_vm8 = vcmp.eq.s32.totalorder %v2976_v18, %v242_v4  ;;  %vm376_vm0 = vcmp.eq.s32.totalorder %v2982_v21, %v242_v4 }
 0x16b   : > { %v330_v7 = vpop.permute.xlu1 %329  ;;  %vm4390_vm6 = vmmov %vm4389_vm5  ;;  %v2532_v8 = vsel %vm1693_vm13, 1.0, %v2743_v51 }
 0x16c   : > { %2570 = vmatprep.mubr.msk.f32.mxu1 %vm4390_vm6, %v2533_v6  ;;  %vm407_vm7 = vcmp.eq.s32.totalorder %v2976_v18, %v330_v7  ;;  %vm408_vm3 = vcmp.eq.s32.totalorder %v2982_v21, %v330_v7 }
 0x16d   : > { %2145 = vmatmul.mubr.f32.gmra.mrb[20].mxu1 %v2532_v8  ;;  %v490_v9 = vpop.permute.xlu0 %489 }
 0x16e   : > { %vm633_vm12 = vcmp.eq.s32.totalorder %v2976_v18, %v490_v9  ;;  %vm634_vm4 = vcmp.eq.s32.totalorder %v2982_v21, %v490_v9 }
 0x16f   : > { %vm697_vm9 = vmor %vm375_vm8, %vm633_vm12  ;;  %v586_v10 = vpop.permute.xlu1 %585 }
 0x170   : > { %vm698_vm11 = vmor %vm376_vm0, %vm634_vm4  ;;  %vm665_vm1 = vcmp.eq.s32.totalorder %v2976_v18, %v586_v10  ;;  %vm666_vm10 = vcmp.eq.s32.totalorder %v2982_v21, %v586_v10 }
 0x171   : > { %vm729_vm2 = vmor %vm407_vm7, %vm665_vm1  ;;  %v812_v11 = vpop.permute.xlu0 %811 }
 0x172   : > { %vm730_vm14 = vmor %vm408_vm3, %vm666_vm10  ;;  %vm955_vm15 = vcmp.eq.s32.totalorder %v2976_v18, %v812_v11  ;;  %vm956_vm5 = vcmp.eq.s32.totalorder %v2982_v21, %v812_v11 }
 0x173   : > { %vm1019_vm13 = vmor %vm697_vm9, %vm955_vm15  ;;  %v908_v14 = vpop.permute.xlu1 %907 }
 0x174   : > { %vm1020_vm6 = vmor %vm698_vm11, %vm956_vm5  ;;  %vm987_vm8 = vcmp.eq.s32.totalorder %v2976_v18, %v908_v14  ;;  %vm988_vm12 = vcmp.eq.s32.totalorder %v2982_v21, %v908_v14 }
 0x175   : > { %vm1051_vm4 = vmor %vm729_vm2, %vm987_vm8  ;;  %v2016_v15 = vpop.f32.mrb[0].mxu0  ;;  %v1134_v19 = vpop.permute.xlu0 %1133 }
 0x176   : > { %vm1052_vm0 = vmor %vm730_vm14, %vm988_vm12  ;;  %vm1277_vm1 = vcmp.eq.s32.totalorder %v2976_v18, %v1134_v19  ;;  %vm1278_vm7 = vcmp.eq.s32.totalorder %v2982_v21, %v1134_v19  ;;  %v2018_v22 = vpop.f32.mrb[1].mxu0 }
 0x177   : > { %vm3890_vm10 = vmor %vm1019_vm13, %vm1277_vm1  ;;  %v1230_v25 = vpop.permute.xlu1 %1229  ;;  %v2096_v16 = vpop.f32.mrb[0].mxu1  ;;  %vm4395_vm1 = vcmask 261120  }
 0x178   : > { %vm1342_vm9 = vmor %vm1020_vm6, %vm1278_vm7  ;;  %vm1309_vm11 = vcmp.eq.s32.totalorder %v2976_v18, %v1230_v25  ;;  %vm1310_vm3 = vcmp.eq.s32.totalorder %v2982_v21, %v1230_v25  ;;  %v2098_v0 = vpop.f32.mrb[1].mxu1 }
 0x179   : > { %vm3896_vm2 = vmor %vm1051_vm4, %vm1309_vm11  ;;  %v1456_v17 = vpop.permute.xlu0 %1455 }
 0x17a   : > { %vm1374_vm14 = vmor %vm1052_vm0, %vm1310_vm3  ;;  %vm1599_vm15 = vcmp.eq.s32.totalorder %v2976_v18, %v1456_v17  ;;  %vm1600_vm5 = vcmp.eq.s32.totalorder %v2982_v21, %v1456_v17 }
 0x17b   : > { %vm1664_vm13 = vmor %vm1342_vm9, %vm1600_vm5  ;;  %v1552_v28 = vpop.permute.xlu1 %1551 }
 0x17c   : > { %vm1631_vm8 = vcmp.eq.s32.totalorder %v2976_v18, %v1552_v28  ;;  %vm1632_vm6 = vcmp.eq.s32.totalorder %v2982_v21, %v1552_v28  ;;  %v2503_v20 = vsel %vm1664_vm13, 1.0, %v2743_v51  ;;  %vm1663_vm12 = vmor %vm3890_vm10, %vm1599_vm15 }
 0x17d   : > { %vm1696_vm4 = vmor %vm1374_vm14, %vm1632_vm6  ;;  %2555 = vmatprep.mubr.msk.f32.mxu0 %vm4395_vm1, %v2503_v20  ;;  %v249_v12 = vpop.permute.xlu0 %248  ;;  %v2502_v29 = vsel %vm1663_vm12, 1.0, %v2743_v51 }
 0x17e   : > { %2070 = vmatmul.mubr.f32.gmra.mrb[22].mxu0 %v2502_v29  ;;  %v2535_v24 = vsel %vm1696_vm4, 1.0, %v2743_v51  ;;  %vm1695_vm0 = vmor %vm3896_vm2, %vm1631_vm8  ;;  %vm377_vm10 = vcmp.eq.s32.totalorder %v2976_v18, %v249_v12  ;;  %vm378_vm3 = vcmp.eq.s32.totalorder %v2982_v21, %v249_v12 }
 0x17f   : > { %v337_v13 = vpop.permute.xlu1 %336  ;;  %vm4396_vm7 = vmmov %vm4395_vm1  ;;  %v2534_v30 = vsel %vm1695_vm0, 1.0, %v2743_v51 }
 0x180   : > { %2571 = vmatprep.mubr.msk.f32.mxu1 %vm4396_vm7, %v2535_v24  ;;  %vm409_vm15 = vcmp.eq.s32.totalorder %v2976_v18, %v337_v13  ;;  %vm410_vm8 = vcmp.eq.s32.totalorder %v2982_v21, %v337_v13 }
 0x181   : > { %2150 = vmatmul.mubr.f32.gmra.mrb[22].mxu1 %v2534_v30  ;;  %v498_v27 = vpop.permute.xlu0 %497 }
 0x182   : > { %vm635_vm9 = vcmp.eq.s32.totalorder %v2976_v18, %v498_v27  ;;  %vm636_vm11 = vcmp.eq.s32.totalorder %v2982_v21, %v498_v27 }
 0x183   : > { %vm699_vm14 = vmor %vm377_vm10, %vm635_vm9  ;;  %v594_v32 = vpop.permute.xlu1 %593 }
 0x184   : > { %vm700_vm2 = vmor %vm378_vm3, %vm636_vm11  ;;  %vm667_vm5 = vcmp.eq.s32.totalorder %v2976_v18, %v594_v32  ;;  %vm668_vm13 = vcmp.eq.s32.totalorder %v2982_v21, %v594_v32  ;;  %vm4403_vm3 = vcmask 261120  }
 0x185   : > { %vm731_vm6 = vmor %vm409_vm15, %vm667_vm5  ;;  %v820_v31 = vpop.permute.xlu0 %819  ;;  %v2175_v40 = vsel %vm4403_vm3, %v2016_v15, -inf }
 0x186   : > { %vm732_vm12 = vmor %vm410_vm8, %vm668_vm13  ;;  %vm957_vm4 = vcmp.eq.s32.totalorder %v2976_v18, %v820_v31  ;;  %vm958_vm1 = vcmp.eq.s32.totalorder %v2982_v21, %v820_v31 }
 0x187   : > { %vm3924_vm0 = vmor %vm699_vm14, %vm957_vm4  ;;  %v916_v35 = vpop.permute.xlu1 %915 }
 0x188   : > { %vm3928_vm7 = vmor %vm700_vm2, %vm958_vm1  ;;  %vm989_vm10 = vcmp.eq.s32.totalorder %v2976_v18, %v916_v35  ;;  %vm990_vm9 = vcmp.eq.s32.totalorder %v2982_v21, %v916_v35 }
 0x189   : > { %vm3934_vm11 = vmor %vm731_vm6, %vm989_vm10  ;;  %v2021_v37 = vpop.f32.mrb[2].mxu0  ;;  %v1142_v39 = vpop.permute.xlu0 %1141 }
 0x18a   : > { %vm3939_vm14 = vmor %vm732_vm12, %vm990_vm9  ;;  %vm1279_vm2 = vcmp.eq.s32.totalorder %v2976_v18, %v1142_v39  ;;  %vm1280_vm5 = vcmp.eq.s32.totalorder %v2982_v21, %v1142_v39  ;;  %v2023_v42 = vpop.f32.mrb[3].mxu0 }
 0x18b   : > { %vm4406_vm15 = vmmov %vm4403_vm3  ;;  %v1238_v45 = vpop.permute.xlu1 %1237  ;;  %v2101_v46 = vpop.f32.mrb[2].mxu1 }
 0x18c   : > { %v2176_v41 = vsel %vm4406_vm15, %v2021_v37, -inf  ;;  %vm3950_vm13 = vmor %vm3924_vm0, %vm1279_vm2  ;;  %vm1311_vm12 = vcmp.eq.s32.totalorder %v2976_v18, %v1238_v45  ;;  %vm1312_vm4 = vcmp.eq.s32.totalorder %v2982_v21, %v1238_v45  ;;  %v2103_v49 = vpop.f32.mrb[3].mxu1 }
 0x18d   : > { %v3946_v43 = vmax.f32 %v2175_v40, %v2176_v41  ;;  %vm4409_vm8 = vmmov %vm4403_vm3  ;;  %v1464_v53 = vpop.permute.xlu0 %1463 }
 0x18e   : > { %v2247_v47 = vsel %vm4409_vm8, %v2096_v16, -inf  ;;  %vm1344_vm6 = vmor %vm3928_vm7, %vm1280_vm5  ;;  %vm1601_vm7 = vcmp.eq.s32.totalorder %v2976_v18, %v1464_v53  ;;  %vm1602_vm9 = vcmp.eq.s32.totalorder %v2982_v21, %v1464_v53 }
 0x18f   : > { %vm4410_vm1 = vmmov %vm4403_vm3  ;;  %v1560_v54 = vpop.permute.xlu1 %1559  ;;  %v2178_v0 = vrot.slane %v3946_v43, 4 }
 0x190   : > { %v2248_v48 = vsel %vm4410_vm1, %v2101_v46, -inf  ;;  %vm3962_vm0 = vmor %vm3934_vm11, %vm1311_vm12  ;;  %vm1633_vm15 = vcmp.eq.s32.totalorder %v2976_v18, %v1560_v54  ;;  %vm1634_vm2 = vcmp.eq.s32.totalorder %v2982_v21, %v1560_v54 }
 0x191   : > { %v3966_v52 = vmax.f32 %v2247_v47, %v2248_v48  ;;  %vm1376_vm10 = vmor %vm3939_vm14, %vm1312_vm4  ;;  %v253_v56 = vpop.permute.xlu0 %252  ;;  %v2179_v20 = vmax.f32 %v3946_v43, %v2178_v0 }
 0x192   : > { %vm1666_vm3 = vmor %vm1344_vm6, %vm1602_vm9 }
 0x193   : > { %v2505_v55 = vsel %vm1666_vm3, 1.0, %v2743_v51  ;;  %vm1665_vm11 = vmor %vm3950_vm13, %vm1601_vm7  ;;  %v341_v59 = vpop.permute.xlu1 %340  ;;  %vm379_vm13 = vcmp.eq.s32.totalorder %v2976_v18, %v253_v56  ;;  %v2250_v17 = vrot.slane %v3966_v52, 4  ;;  %v2180_v36 = vrot.slane %v2179_v20, 2 }
 0x194   : > { %vm1698_vm5 = vmor %vm1376_vm10, %vm1634_vm2  ;;  %v2504_v57 = vsel %vm1665_vm11, 1.0, %v2743_v51  ;;  %vm411_vm7 = vcmp.eq.s32.totalorder %v2976_v18, %v341_v59 }
 0x195   : > { %vm4413_vm8 = vmmov %vm4410_vm1  ;;  %v2537_v58 = vsel %vm1698_vm5, 1.0, %v2743_v51  ;;  %v502_v61 = vpop.permute.xlu0 %501  ;;  %v2251_v13 = vmax.f32 %v3966_v52, %v2250_v17  ;;  %v2181_v52 = vmax.f32 %v2179_v20, %v2180_v36 }
 0x196   : > { %2556 = vmatprep.mubr.msk.f32.mxu0 %vm4413_vm8, %v2505_v55  ;;  %vm1697_vm14 = vmor %vm3962_vm0, %vm1633_vm15  ;;  %vm637_vm12 = vcmp.eq.s32.totalorder %v2976_v18, %v502_v61  ;;  %vm638_vm4 = vcmp.eq.s32.totalorder %v2982_v21, %v502_v61  ;;  %vm412_vm15 = vcmp.eq.s32.totalorder %v2982_v21, %v341_v59 }
 0x197   : > { %2075 = vmatmul.mubr.f32.gmra.mrb[24].mxu0 %v2504_v57  ;;  %vm4414_vm6 = vmmov %vm4410_vm1  ;;  %v2536_v60 = vsel %vm1697_vm14, 1.0, %v2743_v51  ;;  %vm380_vm1 = vcmp.eq.s32.totalorder %v2982_v21, %v253_v56  ;;  %v598_v62 = vpop.permute.xlu1 %597  ;;  %v2252_v45 = vrot.slane %v2251_v13, 2 }
 0x198   : > { %2572 = vmatprep.mubr.msk.f32.mxu1 %vm4414_vm6, %v2537_v58  ;;  %vm701_vm10 = vmor %vm379_vm13, %vm637_vm12  ;;  %vm669_vm9 = vcmp.eq.s32.totalorder %v2976_v18, %v598_v62  ;;  %vm670_vm3 = vcmp.eq.s32.totalorder %v2982_v21, %v598_v62 }
 0x199   : > { %2155 = vmatmul.mubr.f32.gmra.mrb[24].mxu1 %v2536_v60  ;;  %vm702_vm0 = vmor %vm380_vm1, %vm638_vm4  ;;  %v824_v63 = vpop.permute.xlu0 %823  ;;  %v2253_v57 = vmax.f32 %v2251_v13, %v2252_v45 }
 0x19a   : > { %vm733_vm2 = vmor %vm411_vm7, %vm669_vm9  ;;  %vm959_vm5 = vcmp.eq.s32.totalorder %v2976_v18, %v824_v63  ;;  %vm960_vm8 = vcmp.eq.s32.totalorder %v2982_v21, %v824_v63  ;;  %v2182_v63 = vrot.slane %v2181_v52, 1 }
 0x19b   : > { %vm734_vm11 = vmor %vm412_vm15, %vm670_vm3  ;;  %v920_v1 = vpop.permute.xlu1 %919  ;;  %v2254_v5 = vrot.slane %v2253_v57, 1 }
 0x19c   : > { %vm1023_vm14 = vmor %vm701_vm10, %vm959_vm5  ;;  %vm991_vm13 = vcmp.eq.s32.totalorder %v2976_v18, %v920_v1  ;;  %vm992_vm12 = vcmp.eq.s32.totalorder %v2982_v21, %v920_v1  ;;  %v2183_v9 = vmax.f32 %v2181_v52, %v2182_v63 }
 0x19d   : > { %vm1024_vm6 = vmor %vm702_vm0, %vm960_vm8  ;;  %v3996_v2 = vpop.f32.mrb[4].mxu0  ;;  %v1146_v3 = vpop.permute.xlu0 %1145 }
 0x19e   : > { %vm1055_vm4 = vmor %vm733_vm2, %vm991_vm13  ;;  %vm1281_vm7 = vcmp.eq.s32.totalorder %v2976_v18, %v1146_v3  ;;  %vm1282_vm9 = vcmp.eq.s32.totalorder %v2982_v21, %v1146_v3  ;;  %v2028_v4 = vpop.f32.mrb[5].mxu0 }
 0x19f   : > { %vm1056_vm1 = vmor %vm734_vm11, %vm992_vm12  ;;  %v1242_v6 = vpop.permute.xlu1 %1241  ;;  %v4004_v7 = vpop.f32.mrb[4].mxu1 }
 0x1a0   : > { %vm4000_vm3 = vmor %vm1023_vm14, %vm1281_vm7  ;;  %vm1313_vm0 = vcmp.eq.s32.totalorder %v2976_v18, %v1242_v6  ;;  %vm1314_vm15 = vcmp.eq.s32.totalorder %v2982_v21, %v1242_v6  ;;  %v2108_v8 = vpop.f32.mrb[5].mxu1  ;;  %vm4419_vm7 = vcmask 261120  }
 0x1a1   : > { %vm1346_vm10 = vmor %vm1024_vm6, %vm1282_vm9  ;;  %v1468_v10 = vpop.permute.xlu0 %1467 }
 0x1a2   : > { %vm4008_vm2 = vmor %vm1055_vm4, %vm1313_vm0  ;;  %vm1603_vm5 = vcmp.eq.s32.totalorder %v2976_v18, %v1468_v10  ;;  %vm1604_vm8 = vcmp.eq.s32.totalorder %v2982_v21, %v1468_v10 }
 0x1a3   : > { %vm1378_vm11 = vmor %vm1056_vm1, %vm1314_vm15  ;;  %v1564_v11 = vpop.permute.xlu1 %1563 }
 0x1a4   : > { %vm1668_vm14 = vmor %vm1346_vm10, %vm1604_vm8  ;;  %vm1635_vm13 = vcmp.eq.s32.totalorder %v2976_v18, %v1564_v11  ;;  %vm1636_vm6 = vcmp.eq.s32.totalorder %v2982_v21, %v1564_v11 }
 0x1a5   : > { %v2507_v14 = vsel %vm1668_vm14, 1.0, %v2743_v51  ;;  %vm1667_vm12 = vmor %vm4000_vm3, %vm1603_vm5  ;;  %v260_v15 = vpop.permute.xlu0 %259 }
 0x1a6   : > { %vm1700_vm4 = vmor %vm1378_vm11, %vm1636_vm6  ;;  %2557 = vmatprep.mubr.msk.f32.mxu0 %vm4419_vm7, %v2507_v14  ;;  %v2506_v19 = vsel %vm1667_vm12, 1.0, %v2743_v51  ;;  %vm381_vm3 = vcmp.eq.s32.totalorder %v2976_v18, %v260_v15  ;;  %vm382_vm15 = vcmp.eq.s32.totalorder %v2982_v21, %v260_v15 }
 0x1a7   : > { %2080 = vmatmul.mubr.f32.gmra.mrb[26].mxu0 %v2506_v19  ;;  %v2539_v22 = vsel %vm1700_vm4, 1.0, %v2743_v51  ;;  %vm1699_vm1 = vmor %vm4008_vm2, %vm1635_vm13  ;;  %v348_v23 = vpop.permute.xlu1 %347  ;;  %v4121_v19 = vld [vmem:[%s4288_s2] ss:$0 sm:$0xff] }
 0x1a8   : > { %vm4420_vm9 = vmmov %vm4419_vm7  ;;  %v2538_v25 = vsel %vm1699_vm1, 1.0, %v2743_v51  ;;  %vm413_vm2 = vcmp.eq.s32.totalorder %v2976_v18, %v348_v23  ;;  %vm414_vm13 = vcmp.eq.s32.totalorder %v2982_v21, %v348_v23  ;;  %v2255_v23 = vmax.f32 %v2253_v57, %v2254_v5 }
 0x1a9   : > { %2573 = vmatprep.mubr.msk.f32.mxu1 %vm4420_vm9, %v2539_v22  ;;  %v510_v16 = vpop.permute.xlu0 %509 }
 0x1aa   : > { %2160 = vmatmul.mubr.f32.gmra.mrb[26].mxu1 %v2538_v25  ;;  %vm639_vm10 = vcmp.eq.s32.totalorder %v2976_v18, %v510_v16  ;;  %vm640_vm0 = vcmp.eq.s32.totalorder %v2982_v21, %v510_v16  ;;  %v2334_v30 = vadd.f32 %v4121_v19, %v2255_v23 }
 0x1ab   : > { %vm703_vm11 = vmor %vm381_vm3, %vm639_vm10  ;;  %v606_v26 = vpop.permute.xlu1 %605 }
 0x1ac   : > { %vm704_vm5 = vmor %vm382_vm15, %vm640_vm0  ;;  %vm671_vm8 = vcmp.eq.s32.totalorder %v2976_v18, %v606_v26  ;;  %vm672_vm14 = vcmp.eq.s32.totalorder %v2982_v21, %v606_v26  ;;  %vm4427_vm15 = vcmask 261120  }
 0x1ad   : > { %vm735_vm6 = vmor %vm413_vm2, %vm671_vm8  ;;  %v832_v28 = vpop.permute.xlu0 %831  ;;  %v2184_v31 = vsel %vm4427_vm15, %v3996_v2, -inf }
 0x1ae   : > { %vm736_vm12 = vmor %vm414_vm13, %vm672_vm14  ;;  %vm961_vm4 = vcmp.eq.s32.totalorder %v2976_v18, %v832_v28  ;;  %vm962_vm7 = vcmp.eq.s32.totalorder %v2982_v21, %v832_v28  ;;  %v2326_v28 = vadd.f32 %v4121_v19, %v2183_v9 }
 0x1af   : > { %vm4039_vm1 = vmor %vm703_vm11, %vm961_vm4  ;;  %v928_v29 = vpop.permute.xlu1 %927 }
 0x1b0   : > { %vm4043_vm9 = vmor %vm704_vm5, %vm962_vm7  ;;  %vm993_vm3 = vcmp.eq.s32.totalorder %v2976_v18, %v928_v29  ;;  %vm994_vm10 = vcmp.eq.s32.totalorder %v2982_v21, %v928_v29 }
 0x1b1   : > { %vm4050_vm0 = vmor %vm735_vm6, %vm993_vm3  ;;  %v2031_v27 = vpop.f32.mrb[6].mxu0  ;;  %v1154_v32 = vpop.permute.xlu0 %1153 }
 0x1b2   : > { %vm4056_vm11 = vmor %vm736_vm12, %vm994_vm10  ;;  %vm1283_vm5 = vcmp.eq.s32.totalorder %v2976_v18, %v1154_v32  ;;  %vm1284_vm8 = vcmp.eq.s32.totalorder %v2982_v21, %v1154_v32  ;;  %v2033_v34 = vpop.f32.mrb[7].mxu0 }
 0x1b3   : > { %vm4430_vm2 = vmmov %vm4427_vm15  ;;  %v1250_v40 = vpop.permute.xlu1 %1249  ;;  %v2111_v38 = vpop.f32.mrb[6].mxu1 }
 0x1b4   : > { %v2185_v35 = vsel %vm4430_vm2, %v2031_v27, -inf  ;;  %vm4065_vm14 = vmor %vm4039_vm1, %vm1283_vm5  ;;  %vm1315_vm12 = vcmp.eq.s32.totalorder %v2976_v18, %v1250_v40  ;;  %vm1316_vm4 = vcmp.eq.s32.totalorder %v2982_v21, %v1250_v40  ;;  %v2113_v44 = vpop.f32.mrb[7].mxu1 }
 0x1b5   : > { %v2186_v37 = vmax.f32 %v2184_v31, %v2185_v35  ;;  %vm4433_vm13 = vmmov %vm4430_vm2  ;;  %v1476_v49 = vpop.permute.xlu0 %1475 }
 0x1b6   : > { %v2256_v41 = vsel %vm4433_vm13, %v4004_v7, -inf  ;;  %vm4073_vm6 = vmor %vm4043_vm9, %vm1284_vm8  ;;  %vm1605_vm3 = vcmp.eq.s32.totalorder %v2976_v18, %v1476_v49  ;;  %vm1606_vm10 = vcmp.eq.s32.totalorder %v2982_v21, %v1476_v49 }
 0x1b7   : > { %vm4436_vm7 = vmmov %vm4430_vm2  ;;  %v2187_v46 = vrot.slane %v2186_v37, 4  ;;  %v1572_v55 = vpop.permute.xlu1 %1571 }
 0x1b8   : > { %v2257_v43 = vsel %vm4436_vm7, %v2111_v38, -inf  ;;  %vm4082_vm1 = vmor %vm4050_vm0, %vm1315_vm12  ;;  %vm1637_vm15 = vcmp.eq.s32.totalorder %v2976_v18, %v1572_v55  ;;  %vm1638_vm2 = vcmp.eq.s32.totalorder %v2982_v21, %v1572_v55 }
 0x1b9   : > { %v2258_v48 = vmax.f32 %v2256_v41, %v2257_v43  ;;  %vm4088_vm9 = vmor %vm4056_vm11, %vm1316_vm4  ;;  %v2188_v53 = vmax.f32 %v2186_v37, %v2187_v46  ;;  %v264_v60 = vpop.permute.xlu0 %263 }
 0x1ba   : > { %vm1670_vm0 = vmor %vm4073_vm6, %vm1606_vm10  ;;  %vm383_vm6 = vcmp.eq.s32.totalorder %v2976_v18, %v264_v60 }
 0x1bb   : > { %v2259_v54 = vrot.slane %v2258_v48, 4  ;;  %v2509_v56 = vsel %vm1670_vm0, 1.0, %v2743_v51  ;;  %vm1669_vm11 = vmor %vm4065_vm14, %vm1605_vm3  ;;  %v2189_v58 = vrot.slane %v2188_v53, 2  ;;  %v352_v3 = vpop.permute.xlu1 %351 }
 0x1bc   : > { %vm1702_vm5 = vmor %vm4088_vm9, %vm1638_vm2  ;;  %v2508_v61 = vsel %vm1669_vm11, 1.0, %v2743_v51  ;;  %vm415_vm9 = vcmp.eq.s32.totalorder %v2976_v18, %v352_v3  ;;  %vm2359_vm11 = vcmask 1041409  }
 0x1bd   : > { %v2260_v59 = vmax.f32 %v2258_v48, %v2259_v54  ;;  %vm4441_vm8 = vmmov %vm4436_vm7  ;;  %v2541_v62 = vsel %vm1702_vm5, 1.0, %v2743_v51  ;;  %v2190_v1 = vmax.f32 %v2188_v53, %v2189_v58  ;;  %v514_v8 = vpop.permute.xlu0 %513 }
 0x1be   : > { %2558 = vmatprep.mubr.msk.f32.mxu0 %vm4441_vm8, %v2509_v56  ;;  %vm1701_vm13 = vmor %vm4082_vm1, %vm1637_vm15  ;;  %vm641_vm12 = vcmp.eq.s32.totalorder %v2976_v18, %v514_v8  ;;  %vm642_vm4 = vcmp.eq.s32.totalorder %v2982_v21, %v514_v8  ;;  %vm416_vm15 = vcmp.eq.s32.totalorder %v2982_v21, %v352_v3 }
 0x1bf   : > { %2085 = vmatmul.mubr.f32.gmra.mrb[28].mxu0 %v2508_v61  ;;  %v2261_v2 = vrot.slane %v2260_v59, 2  ;;  %vm4442_vm14 = vmmov %vm4436_vm7  ;;  %v2540_v4 = vsel %vm1701_vm13, 1.0, %v2743_v51  ;;  %v2191_v6 = vrot.slane %v2190_v1, 1  ;;  %vm384_vm7 = vcmp.eq.s32.totalorder %v2982_v21, %v264_v60  ;;  %v610_v15 = vpop.permute.xlu1 %609 }
 0x1c0   : > { %2574 = vmatprep.mubr.msk.f32.mxu1 %vm4442_vm14, %v2541_v62  ;;  %vm4114_vm1 = vmor %vm383_vm6, %vm641_vm12  ;;  %vm673_vm10 = vcmp.eq.s32.totalorder %v2976_v18, %v610_v15  ;;  %vm674_vm0 = vcmp.eq.s32.totalorder %v2982_v21, %v610_v15 }
 0x1c1   : > { %2165 = vmatmul.mubr.f32.gmra.mrb[28].mxu1 %v2540_v4  ;;  %v2262_v7 = vmax.f32 %v2260_v59, %v2261_v2  ;;  %v2192_v10 = vmax.f32 %v2190_v1, %v2191_v6  ;;  %vm4124_vm3 = vmor %vm384_vm7, %vm642_vm4  ;;  %v836_v26 = vpop.permute.xlu0 %835 }
 0x1c2   : > { %vm4132_vm2 = vmor %vm415_vm9, %vm673_vm10  ;;  %vm963_vm8 = vcmp.eq.s32.totalorder %v2976_v18, %v836_v26  ;;  %vm964_vm13 = vcmp.eq.s32.totalorder %v2982_v21, %v836_v26 }
 0x1c3   : > { %v2263_v11 = vrot.slane %v2262_v7, 1  ;;  %v2327_v25 = vadd.f32 %v4121_v19, %v2192_v10  ;;  %vm4136_vm5 = vmor %vm416_vm15, %vm674_vm0  ;;  %v932_v24 = vpop.permute.xlu1 %931 }
 0x1c4   : > { %vm4146_vm14 = vmor %vm4114_vm1, %vm963_vm8  ;;  %vm995_vm12 = vcmp.eq.s32.totalorder %v2976_v18, %v932_v24  ;;  %vm996_vm4 = vcmp.eq.s32.totalorder %v2982_v21, %v932_v24 }
 0x1c5   : > { %v2264_v16 = vmax.f32 %v2262_v7, %v2263_v11  ;;  %v2358_v20 = vrot.slane %v2327_v25, 7  ;;  %vm4152_vm6 = vmor %vm4124_vm3, %vm964_vm13  ;;  %v2036_v33 = vpop.f32.mrb[8].mxu0  ;;  %v1158_v35 = vpop.permute.xlu0 %1157 }
 0x1c6   : > { %vm4164_vm7 = vmor %vm4132_vm2, %vm995_vm12  ;;  %vm1285_vm9 = vcmp.eq.s32.totalorder %v2976_v18, %v1158_v35  ;;  %vm1286_vm3 = vcmp.eq.s32.totalorder %v2982_v21, %v1158_v35  ;;  %v2038_v36 = vpop.f32.mrb[9].mxu0 }
 0x1c7   : > { %v2335_v12 = vadd.f32 %v4121_v19, %v2264_v16  ;;  %v4160_v27 = vsel %vm2359_vm11, %v2358_v20, %v2326_v28  ;;  %vm4170_vm1 = vmor %vm4136_vm5, %vm996_vm4  ;;  %v1254_v39 = vpop.permute.xlu1 %1253  ;;  %v2116_v40 = vpop.f32.mrb[8].mxu1 }
 0x1c8   : > { %vm1349_vm10 = vmor %vm4146_vm14, %vm1285_vm9  ;;  %vm1317_vm0 = vcmp.eq.s32.totalorder %v2976_v18, %v1254_v39  ;;  %vm1318_vm15 = vcmp.eq.s32.totalorder %v2982_v21, %v1254_v39  ;;  %v2118_v38 = vpop.f32.mrb[9].mxu1 }
 0x1c9   : > { %v2379_v32 = vrot.slane %v2335_v12, 7  ;;  %vm1350_vm2 = vmor %vm4152_vm6, %vm1286_vm3  ;;  %v1480_v41 = vpop.permute.xlu0 %1479  ;;  %vm4459_vm3 = vcmask 261120  }
 0x1ca   : > { %vm1381_vm5 = vmor %vm4164_vm7, %vm1317_vm0  ;;  %vm1607_vm8 = vcmp.eq.s32.totalorder %v2976_v18, %v1480_v41 }
 0x1cb   : > { %v2380_v37 = vsel %vm2359_vm11, %v2379_v32, %v2334_v30  ;;  %vm1608_vm11 = vcmp.eq.s32.totalorder %v2982_v21, %v1480_v41  ;;  %vm1382_vm13 = vmor %vm4170_vm1, %vm1318_vm15  ;;  %v1576_v42 = vpop.permute.xlu1 %1575 }
 0x1cc   : > { %vm1671_vm14 = vmor %vm1349_vm10, %vm1607_vm8  ;;  %vm1639_vm4 = vcmp.eq.s32.totalorder %v2976_v18, %v1576_v42  ;;  %vm1640_vm9 = vcmp.eq.s32.totalorder %v2982_v21, %v1576_v42 }
 0x1cd   : > { %vm1672_vm12 = vmor %vm1350_vm2, %vm1608_vm11  ;;  %v2510_v43 = vsel %vm1671_vm14, 1.0, %v2743_v51 }
 0x1ce   : > { %v2511_v44 = vsel %vm1672_vm12, 1.0, %v2743_v51  ;;  %vm1703_vm6 = vmor %vm1381_vm5, %vm1639_vm4  ;;  %vm2362_vm5 = vcmask 1042434   ;;  %vm2365_vm12 = vcmask 1043459  }
 0x1cf   : > { %vm1704_vm7 = vmor %vm1382_vm13, %vm1640_vm9  ;;  %2559 = vmatprep.mubr.msk.f32.mxu0 %vm4459_vm3, %v2511_v44  ;;  %v2542_v45 = vsel %vm1703_vm6, 1.0, %v2743_v51 }
 0x1d0   : > { %v2543_v46 = vsel %vm1704_vm7, 1.0, %v2743_v51  ;;  %2090 = vmatmul.mubr.f32.gmra.mrb[30].mxu0 %v2510_v43  ;;  %vm4460_vm1 = vmmov %vm4459_vm3  ;;  %vm2368_vm3 = vcmask 1044484  }
 0x1d1   : > { %2575 = vmatprep.mubr.msk.f32.mxu1 %vm4460_vm1, %v2543_v46  ;;  %vm4461_vm10 = vmmov %vm4460_vm1 }
 0x1d2   : > { %2170 = vmatmul.mubr.f32.gmra.mrb[30].mxu1 %v2542_v45  ;;  %v2193_v18 = vsel %vm4461_vm10, %v2036_v33, -inf  ;;  %vm4462_vm0 = vmmov %vm4460_vm1 }
 0x1d3   : > { %vm4463_vm15 = vmmov %vm4462_vm0 }
 0x1d4   : > { %v2265_v52 = vsel %vm4463_vm15, %v2116_v40, -inf  ;;  %vm4464_vm2 = vmmov %vm4462_vm0 }
 0x1d5   : > { %vm4465_vm8 = vmmov %vm4462_vm0 }
 0x1d6   : > { %vm4466_vm11 = vmmov %vm4462_vm0 }
 0x1d7   : > { %vm4467_vm13 = vmmov %vm4462_vm0 }
 0x1d8   : > { %vm4468_vm14 = vmmov %vm4462_vm0 }
 0x1d9   : > { %v2041_v47 = vpop.f32.mrb[10].mxu0  ;;  %vm4469_vm4 = vmmov %vm4462_vm0 }
 0x1da   : > { %v2194_v21 = vsel %vm4462_vm0, %v2041_v47, -inf  ;;  %v2043_v48 = vpop.f32.mrb[11].mxu0  ;;  %vm4470_vm9 = vmmov %vm4462_vm0 }
 0x1db   : > { %v2195_v49 = vmax.f32 %v2193_v18, %v2194_v21  ;;  %v2121_v50 = vpop.f32.mrb[10].mxu1  ;;  %vm4471_vm6 = vmmov %vm4462_vm0 }
 0x1dc   : > { %v2266_v53 = vsel %vm4464_vm2, %v2121_v50, -inf  ;;  %v2123_v54 = vpop.f32.mrb[11].mxu1  ;;  %vm4472_vm7 = vmmov %vm4462_vm0  ;;  %vm2371_vm2 = vcmask 1045509  }
 0x1dd   : > { %v2196_v55 = vrot.slane %v2195_v49, 4  ;;  %v2267_v56 = vmax.f32 %v2265_v52, %v2266_v53  ;;  %vm4473_vm1 = vmmov %vm4462_vm0 }
 0x1de   : > { %vm4474_vm10 = vmmov %vm4462_vm0 }
 0x1df   : > { %v2197_v51 = vmax.f32 %v2195_v49, %v2196_v55  ;;  %v2268_v57 = vrot.slane %v2267_v56, 4  ;;  %vm4475_vm15 = vmmov %vm4462_vm0 }
 0x1e1   : > { %v2198_v58 = vrot.slane %v2197_v51, 2  ;;  %v2269_v59 = vmax.f32 %v2267_v56, %v2268_v57 }
 0x1e3   : > { %v2199_v60 = vmax.f32 %v2197_v51, %v2198_v58  ;;  %v2270_v61 = vrot.slane %v2269_v59, 2 }
 0x1e5   : > { %v2200_v62 = vrot.slane %v2199_v60, 1  ;;  %v2271_v63 = vmax.f32 %v2269_v59, %v2270_v61 }
 0x1e7   : > { %v2201_v1 = vmax.f32 %v2199_v60, %v2200_v62  ;;  %v2272_v2 = vrot.slane %v2271_v63, 1 }
 0x1e9   : > { %v2328_v3 = vadd.f32 %v4121_v19, %v2201_v1  ;;  %v2273_v4 = vmax.f32 %v2271_v63, %v2272_v2 }
 0x1eb   : > { %v2361_v5 = vrot.slane %v2328_v3, 6  ;;  %v2336_v6 = vadd.f32 %v4121_v19, %v2273_v4 }
 0x1ed   : > { %v2363_v7 = vsel %vm2362_vm5, %v2361_v5, %v4160_v27  ;;  %v2381_v8 = vrot.slane %v2336_v6, 6  ;;  %v2046_v9 = vpop.f32.mrb[12].mxu0 }
 0x1ee   : > { %v2048_v10 = vpop.f32.mrb[13].mxu0  ;;  %v2202_v23 = vsel %vm4465_vm8, %v2046_v9, -inf  ;;  %vm4477_vm8 = vmmov %vm4462_vm0 }
 0x1ef   : > { %v2382_v11 = vsel %vm2362_vm5, %v2381_v8, %v2380_v37  ;;  %v2126_v14 = vpop.f32.mrb[12].mxu1  ;;  %vm4476_vm5 = vmmov %vm4462_vm0 }
 0x1f0   : > { %v2128_v15 = vpop.f32.mrb[13].mxu1  ;;  %v2274_v17 = vsel %vm4467_vm13, %v2126_v14, -inf  ;;  %vm4479_vm13 = vmmov %vm4462_vm0 }
 0x201   : > { %v2051_v22 = vpop.f32.mrb[14].mxu0 }
 0x202   : > { %v2203_v25 = vsel %vm4466_vm11, %v2051_v22, -inf  ;;  %v2053_v16 = vpop.f32.mrb[15].mxu0  ;;  %vm4478_vm11 = vmmov %vm4462_vm0 }
 0x203   : > { %v2204_v0 = vmax.f32 %v2202_v23, %v2203_v25  ;;  %v2131_v26 = vpop.f32.mrb[14].mxu1 }
 0x204   : > { %v2275_v28 = vsel %vm4468_vm14, %v2131_v26, -inf  ;;  %v2133_v20 = vpop.f32.mrb[15].mxu1  ;;  %vm2374_vm14 = vcmask 1046534  }
 0x205   : > { %v2205_v12 = vrot.slane %v2204_v0, 4  ;;  %v2276_v29 = vmax.f32 %v2274_v17, %v2275_v28 }
 0x207   : > { %v2206_v24 = vmax.f32 %v2204_v0, %v2205_v12  ;;  %v2277_v13 = vrot.slane %v2276_v29, 4 }
 0x209   : > { %v2207_v30 = vrot.slane %v2206_v24, 2  ;;  %v2278_v27 = vmax.f32 %v2276_v29, %v2277_v13 }
 0x20b   : > { %v2208_v32 = vmax.f32 %v2206_v24, %v2207_v30  ;;  %v2279_v31 = vrot.slane %v2278_v27, 2 }
 0x20d   : > { %v2209_v33 = vrot.slane %v2208_v32, 1  ;;  %v2280_v35 = vmax.f32 %v2278_v27, %v2279_v31 }
 0x20f   : > { %v2210_v34 = vmax.f32 %v2208_v32, %v2209_v33  ;;  %v2281_v36 = vrot.slane %v2280_v35, 1 }
 0x211   : > { %v2329_v37 = vadd.f32 %v4121_v19, %v2210_v34  ;;  %v2282_v39 = vmax.f32 %v2280_v35, %v2281_v36 }
 0x213   : > { %v2364_v40 = vrot.slane %v2329_v37, 5  ;;  %v2337_v38 = vadd.f32 %v4121_v19, %v2282_v39 }
 0x215   : > { %v2366_v41 = vsel %vm2365_vm12, %v2364_v40, %v2363_v7  ;;  %v2383_v42 = vrot.slane %v2337_v38, 5  ;;  %v2056_v43 = vpop.f32.mrb[16].mxu0 }
 0x216   : > { %v2058_v44 = vpop.f32.mrb[17].mxu0  ;;  %v2211_v21 = vsel %vm4469_vm4, %v2056_v43, -inf  ;;  %vm4481_vm4 = vmmov %vm4462_vm0 }
 0x217   : > { %v2384_v45 = vsel %vm2365_vm12, %v2383_v42, %v2382_v11  ;;  %v2136_v46 = vpop.f32.mrb[16].mxu1  ;;  %vm4480_vm12 = vmmov %vm4462_vm0 }
 0x218   : > { %v2138_v47 = vpop.f32.mrb[17].mxu1  ;;  %v2283_v53 = vsel %vm4471_vm6, %v2136_v46, -inf  ;;  %vm4483_vm6 = vmmov %vm4462_vm0 }
 0x229   : > { %v2061_v18 = vpop.f32.mrb[18].mxu0 }
 0x22a   : > { %v2212_v48 = vsel %vm4470_vm9, %v2061_v18, -inf  ;;  %v2063_v49 = vpop.f32.mrb[19].mxu0  ;;  %vm4482_vm9 = vmmov %vm4462_vm0 }
 0x22b   : > { %v2213_v50 = vmax.f32 %v2211_v21, %v2212_v48  ;;  %v2141_v52 = vpop.f32.mrb[18].mxu1 }
 0x22c   : > { %v2284_v54 = vsel %vm4472_vm7, %v2141_v52, -inf  ;;  %v2143_v55 = vpop.f32.mrb[19].mxu1  ;;  %vm2377_vm7 = vcmask 1047559  }
 0x22d   : > { %v2214_v56 = vrot.slane %v2213_v50, 4  ;;  %v2285_v51 = vmax.f32 %v2283_v53, %v2284_v54 }
 0x22f   : > { %v2215_v57 = vmax.f32 %v2213_v50, %v2214_v56  ;;  %v2286_v58 = vrot.slane %v2285_v51, 4 }
 0x231   : > { %v2216_v59 = vrot.slane %v2215_v57, 2  ;;  %v2287_v60 = vmax.f32 %v2285_v51, %v2286_v58 }
 0x233   : > { %v2217_v61 = vmax.f32 %v2215_v57, %v2216_v59  ;;  %v2288_v62 = vrot.slane %v2287_v60, 2 }
 0x235   : > { %v2218_v63 = vrot.slane %v2217_v61, 1  ;;  %v2289_v1 = vmax.f32 %v2287_v60, %v2288_v62 }
 0x237   : > { %v2219_v2 = vmax.f32 %v2217_v61, %v2218_v63  ;;  %v2290_v3 = vrot.slane %v2289_v1, 1 }
 0x239   : > { %v2330_v4 = vadd.f32 %v4121_v19, %v2219_v2  ;;  %v2291_v5 = vmax.f32 %v2289_v1, %v2290_v3 }
 0x23b   : > { %v2367_v6 = vrot.slane %v2330_v4, 4  ;;  %v2338_v7 = vadd.f32 %v4121_v19, %v2291_v5 }
 0x23d   : > { %v2369_v8 = vsel %vm2368_vm3, %v2367_v6, %v2366_v41  ;;  %v2385_v9 = vrot.slane %v2338_v7, 4  ;;  %v2066_v10 = vpop.f32.mrb[20].mxu0 }
 0x23e   : > { %v2068_v11 = vpop.f32.mrb[21].mxu0  ;;  %v2220_v25 = vsel %vm4473_vm1, %v2066_v10, -inf  ;;  %vm4485_vm1 = vmmov %vm4462_vm0 }
 0x23f   : > { %v2386_v14 = vsel %vm2368_vm3, %v2385_v9, %v2384_v45  ;;  %vm4484_vm3 = vmmov %vm4462_vm0 }
 0x240   : > { %v2146_v15 = vpop.f32.mrb[20].mxu1 }
 0x241   : > { %v2148_v22 = vpop.f32.mrb[21].mxu1  ;;  %v2292_v28 = vsel %vm4462_vm0, %v2146_v15, -inf }
 0x251   : > { %v2071_v23 = vpop.f32.mrb[22].mxu0 }
 0x252   : > { %v2221_v16 = vsel %vm4474_vm10, %v2071_v23, -inf  ;;  %v2073_v0 = vpop.f32.mrb[23].mxu0 }
 0x253   : > { %v2222_v26 = vmax.f32 %v2220_v25, %v2221_v16 }
 0x254   : > { %v2151_v17 = vpop.f32.mrb[22].mxu1 }
 0x255   : > { %v2293_v20 = vsel %vm4475_vm15, %v2151_v17, -inf  ;;  %v2153_v12 = vpop.f32.mrb[23].mxu1  ;;  %v2223_v29 = vrot.slane %v2222_v26, 4 }
 0x256   : > { %v2294_v24 = vmax.f32 %v2292_v28, %v2293_v20 }
 0x257   : > { %v2224_v13 = vmax.f32 %v2222_v26, %v2223_v29 }
 0x258   : > { %v2295_v30 = vrot.slane %v2294_v24, 4 }
 0x259   : > { %v2225_v27 = vrot.slane %v2224_v13, 2 }
 0x25a   : > { %v2296_v32 = vmax.f32 %v2294_v24, %v2295_v30 }
 0x25b   : > { %v2226_v31 = vmax.f32 %v2224_v13, %v2225_v27 }
 0x25c   : > { %v2297_v33 = vrot.slane %v2296_v32, 2 }
 0x25d   : > { %v2227_v35 = vrot.slane %v2226_v31, 1 }
 0x25e   : > { %v2298_v34 = vmax.f32 %v2296_v32, %v2297_v33 }
 0x25f   : > { %v2228_v36 = vmax.f32 %v2226_v31, %v2227_v35 }
 0x260   : > { %v2299_v37 = vrot.slane %v2298_v34, 1 }
 0x261   : > { %v2331_v39 = vadd.f32 %v4121_v19, %v2228_v36 }
 0x262   : > { %v2300_v40 = vmax.f32 %v2298_v34, %v2299_v37 }
 0x263   : > { %v2370_v38 = vrot.slane %v2331_v39, 3 }
 0x264   : > { %v2339_v41 = vadd.f32 %v4121_v19, %v2300_v40 }
 0x265   : > { %v2372_v42 = vsel %vm2371_vm2, %v2370_v38, %v2369_v8 }
 0x266   : > { %v2387_v43 = vrot.slane %v2339_v41, 3 }
 0x268   : > { %v2388_v46 = vsel %vm2371_vm2, %v2387_v43, %v2386_v14 }
 0x26a   : > { %v2076_v44 = vpop.f32.mrb[24].mxu0 }
 0x26b   : > { %v2078_v45 = vpop.f32.mrb[25].mxu0  ;;  %v2229_v48 = vsel %vm4476_vm5, %v2076_v44, -inf }
 0x26c   : > { %v2156_v47 = vpop.f32.mrb[24].mxu1 }
 0x26d   : > { %v2158_v18 = vpop.f32.mrb[25].mxu1  ;;  %v2301_v54 = vsel %vm4478_vm11, %v2156_v47, -inf }
 0x27a   : > { %v2081_v21 = vpop.f32.mrb[26].mxu0 }
 0x27b   : > { %v2230_v49 = vsel %vm4477_vm8, %v2081_v21, -inf  ;;  %v2083_v50 = vpop.f32.mrb[27].mxu0 }
 0x27c   : > { %v2231_v52 = vmax.f32 %v2229_v48, %v2230_v49 }
 0x27d   : > { %v2161_v53 = vpop.f32.mrb[26].mxu1 }
 0x27e   : > { %v2302_v55 = vsel %vm4479_vm13, %v2161_v53, -inf  ;;  %v2163_v56 = vpop.f32.mrb[27].mxu1  ;;  %v2232_v51 = vrot.slane %v2231_v52, 4 }
 0x27f   : > { %v2303_v57 = vmax.f32 %v2301_v54, %v2302_v55 }
 0x280   : > { %v2233_v58 = vmax.f32 %v2231_v52, %v2232_v51 }
 0x281   : > { %v2304_v59 = vrot.slane %v2303_v57, 4 }
 0x282   : > { %v2234_v60 = vrot.slane %v2233_v58, 2 }
 0x283   : > { %v2305_v61 = vmax.f32 %v2303_v57, %v2304_v59 }
 0x284   : > { %v2235_v62 = vmax.f32 %v2233_v58, %v2234_v60 }
 0x285   : > { %v2306_v63 = vrot.slane %v2305_v61, 2 }
 0x286   : > { %v2236_v1 = vrot.slane %v2235_v62, 1 }
 0x287   : > { %v2307_v2 = vmax.f32 %v2305_v61, %v2306_v63 }
 0x288   : > { %v2237_v3 = vmax.f32 %v2235_v62, %v2236_v1 }
 0x289   : > { %v2308_v4 = vrot.slane %v2307_v2, 1 }
 0x28a   : > { %v2332_v5 = vadd.f32 %v4121_v19, %v2237_v3 }
 0x28b   : > { %v2309_v6 = vmax.f32 %v2307_v2, %v2308_v4 }
 0x28c   : > { %v2373_v7 = vrot.slane %v2332_v5, 2 }
 0x28d   : > { %v2340_v8 = vadd.f32 %v4121_v19, %v2309_v6 }
 0x28e   : > { %v2375_v9 = vsel %vm2374_vm14, %v2373_v7, %v2372_v42 }
 0x28f   : > { %v2389_v10 = vrot.slane %v2340_v8, 2 }
 0x291   : > { %v2390_v15 = vsel %vm2374_vm14, %v2389_v10, %v2388_v46 }
 0x292   : > { %v2086_v11 = vpop.f32.mrb[28].mxu0 }
 0x293   : > { %v2088_v14 = vpop.f32.mrb[29].mxu0  ;;  %v2238_v16 = vsel %vm4480_vm12, %v2086_v11, -inf }
 0x294   : > { %v2166_v22 = vpop.f32.mrb[28].mxu1 }
 0x295   : > { %v2168_v23 = vpop.f32.mrb[29].mxu1  ;;  %v2310_v20 = vsel %vm4482_vm9, %v2166_v22, -inf }
 0x2a3   : > { %v2091_v25 = vpop.f32.mrb[30].mxu0 }
 0x2a4   : > { %v2239_v0 = vsel %vm4481_vm4, %v2091_v25, -inf  ;;  %v2093_v26 = vpop.f32.mrb[31].mxu0 }
 0x2a5   : > { %v2240_v17 = vmax.f32 %v2238_v16, %v2239_v0  ;;  %v2171_v28 = vpop.f32.mrb[30].mxu1 }
 0x2a6   : > { %v2311_v12 = vsel %vm4483_vm6, %v2171_v28, -inf  ;;  %v2173_v29 = vpop.f32.mrb[31].mxu1 }
 0x2a7   : > { %v2241_v24 = vrot.slane %v2240_v17, 4  ;;  %v2312_v13 = vmax.f32 %v2310_v20, %v2311_v12 }
 0x2a9   : > { %v2242_v30 = vmax.f32 %v2240_v17, %v2241_v24  ;;  %v2313_v27 = vrot.slane %v2312_v13, 4 }
 0x2ab   : > { %v2243_v32 = vrot.slane %v2242_v30, 2  ;;  %v2314_v31 = vmax.f32 %v2312_v13, %v2313_v27 }
 0x2ad   : > { %v2244_v33 = vmax.f32 %v2242_v30, %v2243_v32  ;;  %v2315_v35 = vrot.slane %v2314_v31, 2 }
 0x2af   : > { %v2245_v34 = vrot.slane %v2244_v33, 1  ;;  %v2316_v36 = vmax.f32 %v2314_v31, %v2315_v35 }
 0x2b1   : > { %v2246_v37 = vmax.f32 %v2244_v33, %v2245_v34  ;;  %v2317_v39 = vrot.slane %v2316_v36, 1 }
 0x2b3   : > { %v2333_v40 = vadd.f32 %v4121_v19, %v2246_v37  ;;  %v2318_v38 = vmax.f32 %v2316_v36, %v2317_v39 }
 0x2b5   : > { %v2376_v41 = vrot.slane %v2333_v40, 1  ;;  %v2341_v42 = vadd.f32 %v4121_v19, %v2318_v38 }
 0x2b7   : > { %v2391_v43 = vrot.slane %v2341_v42, 1  ;;  %v2378_v44 = vsel %vm2377_vm7, %v2376_v41, %v2375_v9 }
 0x2b8   : > { %2395 = vst.msk [vmem:[%s164_s11] sm:$0xff] %vm4484_vm3, %v2378_v44 }
 0x2b9   : > { %v2392_v45 = vsel %vm2377_vm7, %v2391_v43, %v2390_v15 }
 0x2ba   : > { %2396 = vst.msk [vmem:[%s164_s11 + $0x8] sm:$0xff] %vm4485_vm1, %v2392_v45 }
 0x2bb   : > { %2691 = shalt.err (!%p2688_p3)
}
 0x2bc   : > { %s2692_s30 = scalar_lea.hbm %s4239_s25, 256  ;;  %s2696_s6 = scalar_lea.hbm %s4289_s3, 512 }
 0x2bd   : > { %p2693_p4 = scmp.ne.s32.totalorder %s4239_s25, %s2692_s30  ;;  %p2697_p9 = scmp.lt.u32.totalorder %s4239_s25, %s4289_s3 }
 0x2be   : > { %p2698_p10 = scmp.lt.u32.totalorder %s2696_s6, %s2692_s30  ;;  %p2700_p12 = scmp.lt.u32.totalorder %s2692_s30, %s4239_s25 }
 0x2bf   : > { %p2694_p7 = pnand %p2693_p4, %p2805_p5 }
 0x2c0   : > { %p2699_p11 = por %p2698_p10, %p2697_p9 }
 0x2c1   : > { %p2695_p8 = pneg %p2694_p7 }
 0x2c2   : > { %p2701_p13 = por %p2700_p12, %p2699_p11 }
 0x2c4   : > { %p2702_p0 = pnand %p2701_p13, %p2695_p8 }
 0x2c6   : > { %2705 = shalt.err (!%p2702_p0)
}
 0x2c7   : > { %s2745_s8 = smov 128   ;;  %s2746_s9 = smov 8  }
 0x2c8   : > { %2633 = dma.vmem_to_hbm [thread:$0]  (%p2805_p5), %s4241_s17, 256, %s4239_s25, %s4245_s16, %s2745_s8, %s2745_s8, %s2746_s9  }
 0x2c9 PF: > { %p2639_p1 = scmp.ge.s32.totalorder %s2740_s15, 2  ;;  %s2426_s10 = sand.u32 1, %s2728_s12  }
 0x2ca   : > { %s2427_s11 = scalar_lea.sflag [#allocation3], %s2426_s10 }
 0x2cb   : > { %p2636_p2 = pnand %p2639_p1, %p2809_p6 }
 0x2cd   : > { %2723 = dma.done.wait (!%p2636_p2), %s2427_s11, 256  }
 0x2ce   : > { %2725 = vsyncadd (!%p2636_p2), %s2427_s11, 4294967040  ;;  %p13_p3 = scmp.ge.s32.totalorder %s2792_s18, 4   ;;  %s4486_s12 = smov %s2732_s13 }
 0x2cf   : > { %s4487_s13 = smov %s2736_s14  ;;  %s4488_s14 = smov %s2803_s21 }
 0x2d0   : > { %s4489_s15 = smov %s2792_s18  ;;  %15 = sbr.rel (!%p13_p3) target bundleno = 3 (0x3), region = 67 }
 0x2d7   :  { %2432 = vsyncpa [#allocation3], 1 }
 0x2d8   :  { %2434 = vsyncpa [#allocation3 + $0x1], 1 }

</bundles_post_ra>
